<compile_context>
chip_gen: v6e
topology: v6e:2x2x1
jax: 0.10.0
libtpu: 0.0.40
codegen_flags: <defaults>
</compile_context>

<pallas_src>
import functools

import jax
import jax.numpy as jnp
from jax.experimental import pallas as pl
from jax.experimental.pallas import tpu as pltpu


def _round_up(x, m):
    return (x + m - 1) // m * m


def _cdiv(a, b):
    return (a + b - 1) // b


# ---------------------------------------------------------------------------
# Pallas kernel: tiled (patches @ weight) with f32 accumulation + bias + act
# ---------------------------------------------------------------------------
def _conv_matmul_kernel(p_ref, w_ref, b_ref, o_ref, acc_ref, *, activation):
    @pl.when(pl.program_id(2) == 0)
    def _init():
        acc_ref[...] = jnp.zeros_like(acc_ref)

    acc_ref[...] += jnp.dot(p_ref[...], w_ref[...],
                            preferred_element_type=jnp.float32)

    @pl.when(pl.program_id(2) == pl.num_programs(2) - 1)
    def _finalize():
        y = acc_ref[...] + b_ref[...]          # (1, tn) broadcasts over rows
        if activation == "leaky_relu":
            y = jnp.where(y >= 0.0, y, 0.2 * y)
        else:  # sigmoid: overflow-safe exp (EUP) + exact divide
            z = jnp.exp(-jnp.abs(y))
            inv = 1.0 / (1.0 + z)
            y = jnp.where(y >= 0.0, inv, z * inv)
        o_ref[...] = y.astype(o_ref.dtype)


def _im2col(x_nhwc, kh, kw, stride, pad):
    """Extract conv patches; K-axis ordering is (kh, kw, cin)."""
    n, h, w, c = x_nhwc.shape
    xp = jnp.pad(x_nhwc, ((0, 0), (pad, pad), (pad, pad), (0, 0)))
    oh = (h + 2 * pad - kh) // stride + 1
    ow = (w + 2 * pad - kw) // stride + 1
    cols = []
    for i in range(kh):
        for j in range(kw):
            cols.append(xp[:, i:i + stride * oh:stride, j:j + stride * ow:stride, :])
    patches = jnp.concatenate(cols, axis=-1)          # (n, oh, ow, kh*kw*c)
    return patches.reshape(n * oh * ow, kh * kw * c), oh, ow


def conv2d_act_pallas(x_nhwc, w_oihw, b, stride, pad, activation, out_dtype):
    """One Conv2d(k=4) + activation; hot path is the tiled Pallas matmul."""
    cout, cin, kh, kw = w_oihw.shape
    n = x_nhwc.shape[0]

    x = x_nhwc.astype(jnp.bfloat16)   # no-op when the previous layer already emitted bf16
    # Pad channels to a multiple of 8 so K = kh*kw*cin_p is natively 128-aligned
    # (only layer 1 needs this) -> no K-padding pass over the patch slab.
    cin_p = _round_up(cin, 8)
    if cin_p != cin:
        x = jnp.pad(x, ((0, 0), (0, 0), (0, 0), (0, cin_p - cin)))

    patches, oh, ow = _im2col(x, kh, kw, stride, pad)
    m, k = patches.shape                               # k is a multiple of 128

    # weight: OIHW -> (kh, kw, cin, cout), pad cin, flatten K to match patches
    w_t = jnp.transpose(w_oihw, (2, 3, 1, 0))
    if cin_p != cin:
        w_t = jnp.pad(w_t, ((0, 0), (0, 0), (0, cin_p - cin), (0, 0)))
    w2d = w_t.reshape(k, cout).astype(jnp.bfloat16)

    # -------- tile selection (MXU/lane friendly, VMEM-bounded on all gens) ----
    np_ = _round_up(cout, 128)
    tn = min(np_, 512)
    while np_ % tn:
        tn -= 128

    tk = min(k, 2048)
    while k % tk:
        tk -= 128

    # Only pad M when the slab is truly tiny (< 16 rows); otherwise rely on a
    # cdiv grid with a masked partial tail block (no extra HBM pass).
    if m < 16:
        patches = jnp.pad(patches, ((0, 16 - m), (0, 0)))
    m_arr = max(m, 16)

    out_bytes = jnp.dtype(out_dtype).itemsize
    # Working-set budget (double-buffered inputs/outputs + f32 acc) ~36 MiB.
    fixed = 2 * tk * tn * 2 + 2 * tn * 4
    per_row = 2 * tk * 2 + 2 * tn * out_bytes + tn * 4
    budget = 36 * 1024 * 1024
    tm = (budget - fixed) // per_row
    tm = min(tm, 4096)
    tm = max(256, (tm // 256) * 256)
    tm = min(tm, max(16, (m_arr // 16) * 16))
    # v7x: keep >= 2 blocks along a "parallel" axis where possible (2 TCs/chip).
    while (np_ // tn) < 2 and _cdiv(m_arr, tm) < 2 and tm >= 32 and (tm // 2) % 16 == 0:
        tm //= 2
    tm = int(tm)

    w_pad = jnp.pad(w2d, ((0, 0), (0, np_ - cout)))
    b_pad = jnp.pad(b.astype(jnp.float32).reshape(1, cout), ((0, 0), (0, np_ - cout)))

    grid = (_cdiv(m_arr, tm), np_ // tn, k // tk)

    # Exact double-buffered VMEM use + ~20% headroom, capped at 48 MiB (v7x-safe).
    block_bytes = (2 * tm * tk * 2 + 2 * tk * tn * 2
                   + 2 * tm * tn * out_bytes + tm * tn * 4 + 2 * tn * 4)
    vmem_limit = int(min(48 * 1024 * 1024,
                         max(block_bytes * 1.2, 16 * 1024 * 1024)))

    cost = pl.CostEstimate(
        flops=2 * m_arr * k * np_,
        transcendentals=(m_arr * np_ if activation == "sigmoid" else 0),
        bytes_accessed=(m_arr * k * 2 + k * np_ * 2 * grid[0]
                        + m_arr * np_ * out_bytes),
    )

    out = pl.pallas_call(
        functools.partial(_conv_matmul_kernel, activation=activation),
        out_shape=jax.ShapeDtypeStruct((m_arr, np_), out_dtype),
        grid_spec=pltpu.PrefetchScalarGridSpec(
            num_scalar_prefetch=0,
            grid=grid,
            in_specs=[
                pl.BlockSpec((tm, tk), lambda i, j, kk: (i, kk)),
                pl.BlockSpec((tk, tn), lambda i, j, kk: (kk, j)),
                pl.BlockSpec((1, tn), lambda i, j, kk: (0, j)),
            ],
            out_specs=pl.BlockSpec((tm, tn), lambda i, j, kk: (i, j)),
            scratch_shapes=[pltpu.VMEM((tm, tn), jnp.float32)],
        ),
        compiler_params=pltpu.CompilerParams(
            dimension_semantics=("parallel", "parallel", "arbitrary"),
            vmem_limit_bytes=vmem_limit,
        ),
        cost_estimate=cost,
    )(patches, w_pad, b_pad)

    return out[:m, :cout].reshape(n, oh, ow, cout)


# ---------------------------------------------------------------------------
# Discriminator: parameters + forward
# ---------------------------------------------------------------------------
_LAYER_STRIDES = (2, 2, 2, 1, 1)
_LAYER_ACTS = ("leaky_relu", "leaky_relu", "leaky_relu", "leaky_relu", "sigmoid")


def init_discriminator_params(key, input_nc, output_nc, ndf):
    """PyTorch-default-style uniform init (deterministic via PRNGKey)."""
    cfg = [
        (input_nc + output_nc, ndf),
        (ndf, ndf * 2),
        (ndf * 2, ndf * 4),
        (ndf * 4, ndf * 8),
        (ndf * 8, 1),
    ]
    params = []
    for cin, cout in cfg:
        key, kw_, kb_ = jax.random.split(key, 3)
        bound = 1.0 / (cin * 4 * 4) ** 0.5
        w = jax.random.uniform(kw_, (cout, cin, 4, 4), jnp.float32, -bound, bound)
        b = jax.random.uniform(kb_, (cout,), jnp.float32, -bound, bound)
        params.append({"w": w, "b": b})
    return params


@jax.jit
def discriminator_forward(x_nchw, params):
    x = jnp.transpose(x_nchw, (0, 2, 3, 1))  # NCHW -> NHWC
    n_layers = len(params)
    for idx, (p, stride, act) in enumerate(zip(params, _LAYER_STRIDES, _LAYER_ACTS)):
        out_dtype = jnp.float32 if idx == n_layers - 1 else jnp.bfloat16
        x = conv2d_act_pallas(x, p["w"], p["b"], stride=stride, pad=1,
                              activation=act, out_dtype=out_dtype)
    return jnp.transpose(x, (0, 3, 1, 2))    # NHWC -> NCHW


# ---------------------------------------------------------------------------
# Pure-JAX references (for correctness sanity checks)
# ---------------------------------------------------------------------------
def reference_forward(x_nchw, params, use_bf16_inputs=False):
    def conv(x, w, b, stride):
        if use_bf16_inputs:
            x = x.astype(jnp.bfloat16)
            w = w.astype(jnp.bfloat16)
        y = jax.lax.conv_general_dilated(
            x, w, window_strides=(stride, stride), padding=((1, 1), (1, 1)),
            dimension_numbers=("NCHW", "OIHW", "NCHW"),
            preferred_element_type=jnp.float32)
        return y + b[None, :, None, None]

    x = x_nchw
    for i, (p, stride) in enumerate(zip(params, _LAYER_STRIDES)):
        x = conv(x, p["w"], p["b"], stride)
        if i < 4:
            x = jnp.where(x >= 0.0, x, 0.2 * x)
        else:
            x = jax.nn.sigmoid(x)
    return x


if __name__ == "__main__":
    # Small shapes: input_nc=2, output_nc=2 (concat -> 4 channels), ndf=8,
    # 32x32 spatial (the minimum power-of-two size for which all 5 convs are valid).
    input_nc, output_nc, ndf = 2, 2, 8
    batch, spatial = 2, 32

    key = jax.random.PRNGKey(0)
    kx, kp = jax.random.split(key)
    x = jax.random.normal(kx, (batch, input_nc + output_nc, spatial, spatial),
                          jnp.float32)
    params = init_discriminator_params(kp, input_nc, output_nc, ndf)

    out = discriminator_forward(x, params)
    out = jax.block_until_ready(out)

    # Tight check vs. a bf16-input / f32-accum reference (matches kernel math).
    ref_bf16 = jax.block_until_ready(reference_forward(x, params, True))
    assert out.shape == ref_bf16.shape, (out.shape, ref_bf16.shape)
    assert jnp.allclose(out, ref_bf16, atol=1e-2, rtol=1e-2), \
        "mismatch vs bf16-matched reference"

    # Loose check vs. the full-f32 reference (module semantics).
    ref_f32 = jax.block_until_ready(reference_forward(x, params, False))
    assert jnp.allclose(out, ref_f32, atol=5e-2, rtol=5e-2), \
        "mismatch vs f32 reference"

    print("KERNEL_OK")
</pallas_src>

<mosaic_0001>
module attributes {stable_mosaic.version = 11 : i64} {
  func.func @_conv_matmul_kernel(%arg0: i32, %arg1: i32, %arg2: i32, %arg3: memref<256x128xbf16, #tpu.memory_space<vmem>>, %arg4: memref<128x128xbf16, #tpu.memory_space<vmem>>, %arg5: memref<1x128xf32, #tpu.memory_space<vmem>>, %arg6: memref<256x128xbf16, #tpu.memory_space<vmem>>, %arg7: memref<256x128xf32, #tpu.memory_space<vmem>>) attributes {dimension_semantics = [#tpu.dimension_semantics<parallel>, #tpu.dimension_semantics<parallel>, #tpu.dimension_semantics<arbitrary>], iteration_bounds = array<i64: 2, 1, 1>, scalar_prefetch = 0 : i64, scratch_operands = 1 : i64, tpu.core_type = #tpu.core_type<tc>, window_params = [{transform_indices = @transform_0, window_bounds = array<i64: 256, 128>}, {transform_indices = @transform_1, window_bounds = array<i64: 128, 128>}, {transform_indices = @transform_2, window_bounds = array<i64: 1, 128>}, {transform_indices = @transform_3, window_bounds = array<i64: 256, 128>}]} {
    %c0_i32 = arith.constant 0 : i32
    %0 = arith.cmpi eq, %arg2, %c0_i32 : i32
    %1 = arith.extui %0 : i1 to i32
    %c0_i32_0 = arith.constant 0 : i32
    %2 = arith.cmpi ne, %1, %c0_i32_0 : i32
    scf.if %2 {
      %cst_10 = arith.constant 0.000000e+00 : f32
      %12 = vector.broadcast %cst_10 : f32 to vector<256x128xf32>
      %c0_11 = arith.constant 0 : index
      %c0_12 = arith.constant 0 : index
      %13 = vector.load %arg7[%c0_11, %c0_12] : memref<256x128xf32, #tpu.memory_space<vmem>>, vector<256x128xf32>
      tpu.vector_store %arg7[%c0_11, %c0_12], %12 {strides = array<i32>} : memref<256x128xf32, #tpu.memory_space<vmem>>, vector<256x128xf32>,
    } else {
    }
    %c0 = arith.constant 0 : index
    %c0_1 = arith.constant 0 : index
    %3 = vector.load %arg7[%c0, %c0_1] : memref<256x128xf32, #tpu.memory_space<vmem>>, vector<256x128xf32>
    %c0_2 = arith.constant 0 : index
    %c0_3 = arith.constant 0 : index
    %4 = vector.load %arg3[%c0_2, %c0_3] : memref<256x128xbf16, #tpu.memory_space<vmem>>, vector<256x128xbf16>
    %c0_4 = arith.constant 0 : index
    %c0_5 = arith.constant 0 : index
    %5 = vector.load %arg4[%c0_4, %c0_5] : memref<128x128xbf16, #tpu.memory_space<vmem>>, vector<128x128xbf16>
    %cst = arith.constant dense<0.000000e+00> : vector<256x128xf32>
    %6 = tpu.matmul %4, %5, %cst {dimension_numbers = #tpu.dot_dimension_numbers<[1], [0], [0], [1], [0, 0, 1, 1], [], []>} : vector<256x128xbf16>, vector<128x128xbf16>, vector<256x128xf32> -> vector<256x128xf32>
    %7 = arith.addf %3, %6 : vector<256x128xf32>
    %c0_6 = arith.constant 0 : index
    %c0_7 = arith.constant 0 : index
    %8 = vector.load %arg7[%c0_6, %c0_7] : memref<256x128xf32, #tpu.memory_space<vmem>>, vector<256x128xf32>
    tpu.vector_store %arg7[%c0_6, %c0_7], %7 {strides = array<i32>} : memref<256x128xf32, #tpu.memory_space<vmem>>, vector<256x128xf32>,
    %c0_i32_8 = arith.constant 0 : i32
    %9 = arith.cmpi eq, %arg2, %c0_i32_8 : i32
    %10 = arith.extui %9 : i1 to i32
    %c0_i32_9 = arith.constant 0 : i32
    %11 = arith.cmpi ne, %10, %c0_i32_9 : i32
    scf.if %11 {
      %c0_10 = arith.constant 0 : index
      %c0_11 = arith.constant 0 : index
      %12 = vector.load %arg7[%c0_10, %c0_11] : memref<256x128xf32, #tpu.memory_space<vmem>>, vector<256x128xf32>
      %c0_12 = arith.constant 0 : index
      %c0_13 = arith.constant 0 : index
      %13 = vector.load %arg5[%c0_12, %c0_13] : memref<1x128xf32, #tpu.memory_space<vmem>>, vector<1x128xf32>
      %14 = vector.broadcast %13 : vector<1x128xf32> to vector<256x128xf32>
      %15 = arith.addf %12, %14 : vector<256x128xf32>
      %cst_14 = arith.constant 0.000000e+00 : f32
      %16 = vector.broadcast %cst_14 : f32 to vector<256x128xf32>
      %17 = arith.cmpf oge, %15, %16 : vector<256x128xf32>
      %cst_15 = arith.constant 2.000000e-01 : f32
      %18 = vector.broadcast %cst_15 : f32 to vector<256x128xf32>
      %19 = arith.mulf %18, %15 : vector<256x128xf32>
      %20 = arith.select %17, %15, %19 : vector<256x128xi1>, vector<256x128xf32>
      %21 = arith.truncf %20 : vector<256x128xf32> to vector<256x128xbf16>
      %c0_16 = arith.constant 0 : index
      %c0_17 = arith.constant 0 : index
      %22 = vector.load %arg6[%c0_16, %c0_17] : memref<256x128xbf16, #tpu.memory_space<vmem>>, vector<256x128xbf16>
      tpu.vector_store %arg6[%c0_16, %c0_17], %21 {strides = array<i32>} : memref<256x128xbf16, #tpu.memory_space<vmem>>, vector<256x128xbf16>,
    } else {
    }
    return
  }
  func.func @transform_0(%arg0: i32, %arg1: i32, %arg2: i32) -> (i32, i32) {
    %c0_i32 = arith.constant 0 : i32
    return %arg0, %arg2 : i32, i32
  }
  func.func @transform_1(%arg0: i32, %arg1: i32, %arg2: i32) -> (i32, i32) {
    %c0_i32 = arith.constant 0 : i32
    return %arg2, %arg1 : i32, i32
  }
  func.func @transform_2(%arg0: i32, %arg1: i32, %arg2: i32) -> (i32, i32) {
    %c0_i32 = arith.constant 0 : i32
    %c0_i32_0 = arith.constant 0 : i32
    return %c0_i32, %arg1 : i32, i32
  }
  func.func @transform_3(%arg0: i32, %arg1: i32, %arg2: i32) -> (i32, i32) {
    %c0_i32 = arith.constant 0 : i32
    return %arg0, %arg1 : i32, i32
  }
}

module attributes {stable_mosaic.version = 11 : i64} {
  func.func @_conv_matmul_kernel(%arg0: i32, %arg1: i32, %arg2: i32, %arg3: memref<64x128xbf16, #tpu.memory_space<vmem>>, %arg4: memref<128x128xbf16, #tpu.memory_space<vmem>>, %arg5: memref<1x128xf32, #tpu.memory_space<vmem>>, %arg6: memref<64x128xbf16, #tpu.memory_space<vmem>>, %arg7: memref<64x128xf32, #tpu.memory_space<vmem>>) attributes {dimension_semantics = [#tpu.dimension_semantics<parallel>, #tpu.dimension_semantics<parallel>, #tpu.dimension_semantics<arbitrary>], iteration_bounds = array<i64: 2, 1, 1>, scalar_prefetch = 0 : i64, scratch_operands = 1 : i64, tpu.core_type = #tpu.core_type<tc>, window_params = [{transform_indices = @transform_0, window_bounds = array<i64: 64, 128>}, {transform_indices = @transform_1, window_bounds = array<i64: 128, 128>}, {transform_indices = @transform_2, window_bounds = array<i64: 1, 128>}, {transform_indices = @transform_3, window_bounds = array<i64: 64, 128>}]} {
    %c0_i32 = arith.constant 0 : i32
    %0 = arith.cmpi eq, %arg2, %c0_i32 : i32
    %1 = arith.extui %0 : i1 to i32
    %c0_i32_0 = arith.constant 0 : i32
    %2 = arith.cmpi ne, %1, %c0_i32_0 : i32
    scf.if %2 {
      %cst_10 = arith.constant 0.000000e+00 : f32
      %12 = vector.broadcast %cst_10 : f32 to vector<64x128xf32>
      %c0_11 = arith.constant 0 : index
      %c0_12 = arith.constant 0 : index
      %13 = vector.load %arg7[%c0_11, %c0_12] : memref<64x128xf32, #tpu.memory_space<vmem>>, vector<64x128xf32>
      tpu.vector_store %arg7[%c0_11, %c0_12], %12 {strides = array<i32>} : memref<64x128xf32, #tpu.memory_space<vmem>>, vector<64x128xf32>,
    } else {
    }
    %c0 = arith.constant 0 : index
    %c0_1 = arith.constant 0 : index
    %3 = vector.load %arg7[%c0, %c0_1] : memref<64x128xf32, #tpu.memory_space<vmem>>, vector<64x128xf32>
    %c0_2 = arith.constant 0 : index
    %c0_3 = arith.constant 0 : index
    %4 = vector.load %arg3[%c0_2, %c0_3] : memref<64x128xbf16, #tpu.memory_space<vmem>>, vector<64x128xbf16>
    %c0_4 = arith.constant 0 : index
    %c0_5 = arith.constant 0 : index
    %5 = vector.load %arg4[%c0_4, %c0_5] : memref<128x128xbf16, #tpu.memory_space<vmem>>, vector<128x128xbf16>
    %cst = arith.constant dense<0.000000e+00> : vector<64x128xf32>
    %6 = tpu.matmul %4, %5, %cst {dimension_numbers = #tpu.dot_dimension_numbers<[1], [0], [0], [1], [0, 0, 1, 1], [], []>} : vector<64x128xbf16>, vector<128x128xbf16>, vector<64x128xf32> -> vector<64x128xf32>
    %7 = arith.addf %3, %6 : vector<64x128xf32>
    %c0_6 = arith.constant 0 : index
    %c0_7 = arith.constant 0 : index
    %8 = vector.load %arg7[%c0_6, %c0_7] : memref<64x128xf32, #tpu.memory_space<vmem>>, vector<64x128xf32>
    tpu.vector_store %arg7[%c0_6, %c0_7], %7 {strides = array<i32>} : memref<64x128xf32, #tpu.memory_space<vmem>>, vector<64x128xf32>,
    %c0_i32_8 = arith.constant 0 : i32
    %9 = arith.cmpi eq, %arg2, %c0_i32_8 : i32
    %10 = arith.extui %9 : i1 to i32
    %c0_i32_9 = arith.constant 0 : i32
    %11 = arith.cmpi ne, %10, %c0_i32_9 : i32
    scf.if %11 {
      %c0_10 = arith.constant 0 : index
      %c0_11 = arith.constant 0 : index
      %12 = vector.load %arg7[%c0_10, %c0_11] : memref<64x128xf32, #tpu.memory_space<vmem>>, vector<64x128xf32>
      %c0_12 = arith.constant 0 : index
      %c0_13 = arith.constant 0 : index
      %13 = vector.load %arg5[%c0_12, %c0_13] : memref<1x128xf32, #tpu.memory_space<vmem>>, vector<1x128xf32>
      %14 = vector.broadcast %13 : vector<1x128xf32> to vector<64x128xf32>
      %15 = arith.addf %12, %14 : vector<64x128xf32>
      %cst_14 = arith.constant 0.000000e+00 : f32
      %16 = vector.broadcast %cst_14 : f32 to vector<64x128xf32>
      %17 = arith.cmpf oge, %15, %16 : vector<64x128xf32>
      %cst_15 = arith.constant 2.000000e-01 : f32
      %18 = vector.broadcast %cst_15 : f32 to vector<64x128xf32>
      %19 = arith.mulf %18, %15 : vector<64x128xf32>
      %20 = arith.select %17, %15, %19 : vector<64x128xi1>, vector<64x128xf32>
      %21 = arith.truncf %20 : vector<64x128xf32> to vector<64x128xbf16>
      %c0_16 = arith.constant 0 : index
      %c0_17 = arith.constant 0 : index
      %22 = vector.load %arg6[%c0_16, %c0_17] : memref<64x128xbf16, #tpu.memory_space<vmem>>, vector<64x128xbf16>
      tpu.vector_store %arg6[%c0_16, %c0_17], %21 {strides = array<i32>} : memref<64x128xbf16, #tpu.memory_space<vmem>>, vector<64x128xbf16>,
    } else {
    }
    return
  }
  func.func @transform_0(%arg0: i32, %arg1: i32, %arg2: i32) -> (i32, i32) {
    %c0_i32 = arith.constant 0 : i32
    return %arg0, %arg2 : i32, i32
  }
  func.func @transform_1(%arg0: i32, %arg1: i32, %arg2: i32) -> (i32, i32) {
    %c0_i32 = arith.constant 0 : i32
    return %arg2, %arg1 : i32, i32
  }
  func.func @transform_2(%arg0: i32, %arg1: i32, %arg2: i32) -> (i32, i32) {
    %c0_i32 = arith.constant 0 : i32
    %c0_i32_0 = arith.constant 0 : i32
    return %c0_i32, %arg1 : i32, i32
  }
  func.func @transform_3(%arg0: i32, %arg1: i32, %arg2: i32) -> (i32, i32) {
    %c0_i32 = arith.constant 0 : i32
    return %arg0, %arg1 : i32, i32
  }
}

module attributes {stable_mosaic.version = 11 : i64} {
  func.func @_conv_matmul_kernel(%arg0: i32, %arg1: i32, %arg2: i32, %arg3: memref<16x256xbf16, #tpu.memory_space<vmem>>, %arg4: memref<256x128xbf16, #tpu.memory_space<vmem>>, %arg5: memref<1x128xf32, #tpu.memory_space<vmem>>, %arg6: memref<16x128xbf16, #tpu.memory_space<vmem>>, %arg7: memref<16x128xf32, #tpu.memory_space<vmem>>) attributes {dimension_semantics = [#tpu.dimension_semantics<parallel>, #tpu.dimension_semantics<parallel>, #tpu.dimension_semantics<arbitrary>], iteration_bounds = array<i64: 2, 1, 1>, scalar_prefetch = 0 : i64, scratch_operands = 1 : i64, tpu.core_type = #tpu.core_type<tc>, window_params = [{transform_indices = @transform_0, window_bounds = array<i64: 16, 256>}, {transform_indices = @transform_1, window_bounds = array<i64: 256, 128>}, {transform_indices = @transform_2, window_bounds = array<i64: 1, 128>}, {transform_indices = @transform_3, window_bounds = array<i64: 16, 128>}]} {
    %c0_i32 = arith.constant 0 : i32
    %0 = arith.cmpi eq, %arg2, %c0_i32 : i32
    %1 = arith.extui %0 : i1 to i32
    %c0_i32_0 = arith.constant 0 : i32
    %2 = arith.cmpi ne, %1, %c0_i32_0 : i32
    scf.if %2 {
      %cst_10 = arith.constant 0.000000e+00 : f32
      %12 = vector.broadcast %cst_10 : f32 to vector<16x128xf32>
      %c0_11 = arith.constant 0 : index
      %c0_12 = arith.constant 0 : index
      %13 = vector.load %arg7[%c0_11, %c0_12] : memref<16x128xf32, #tpu.memory_space<vmem>>, vector<16x128xf32>
      tpu.vector_store %arg7[%c0_11, %c0_12], %12 {strides = array<i32>} : memref<16x128xf32, #tpu.memory_space<vmem>>, vector<16x128xf32>,
    } else {
    }
    %c0 = arith.constant 0 : index
    %c0_1 = arith.constant 0 : index
    %3 = vector.load %arg7[%c0, %c0_1] : memref<16x128xf32, #tpu.memory_space<vmem>>, vector<16x128xf32>
    %c0_2 = arith.constant 0 : index
    %c0_3 = arith.constant 0 : index
    %4 = vector.load %arg3[%c0_2, %c0_3] : memref<16x256xbf16, #tpu.memory_space<vmem>>, vector<16x256xbf16>
    %c0_4 = arith.constant 0 : index
    %c0_5 = arith.constant 0 : index
    %5 = vector.load %arg4[%c0_4, %c0_5] : memref<256x128xbf16, #tpu.memory_space<vmem>>, vector<256x128xbf16>
    %cst = arith.constant dense<0.000000e+00> : vector<16x128xf32>
    %6 = tpu.matmul %4, %5, %cst {dimension_numbers = #tpu.dot_dimension_numbers<[1], [0], [0], [1], [0, 0, 1, 1], [], []>} : vector<16x256xbf16>, vector<256x128xbf16>, vector<16x128xf32> -> vector<16x128xf32>
    %7 = arith.addf %3, %6 : vector<16x128xf32>
    %c0_6 = arith.constant 0 : index
    %c0_7 = arith.constant 0 : index
    %8 = vector.load %arg7[%c0_6, %c0_7] : memref<16x128xf32, #tpu.memory_space<vmem>>, vector<16x128xf32>
    tpu.vector_store %arg7[%c0_6, %c0_7], %7 {strides = array<i32>} : memref<16x128xf32, #tpu.memory_space<vmem>>, vector<16x128xf32>,
    %c0_i32_8 = arith.constant 0 : i32
    %9 = arith.cmpi eq, %arg2, %c0_i32_8 : i32
    %10 = arith.extui %9 : i1 to i32
    %c0_i32_9 = arith.constant 0 : i32
    %11 = arith.cmpi ne, %10, %c0_i32_9 : i32
    scf.if %11 {
      %c0_10 = arith.constant 0 : index
      %c0_11 = arith.constant 0 : index
      %12 = vector.load %arg7[%c0_10, %c0_11] : memref<16x128xf32, #tpu.memory_space<vmem>>, vector<16x128xf32>
      %c0_12 = arith.constant 0 : index
      %c0_13 = arith.constant 0 : index
      %13 = vector.load %arg5[%c0_12, %c0_13] : memref<1x128xf32, #tpu.memory_space<vmem>>, vector<1x128xf32>
      %14 = vector.broadcast %13 : vector<1x128xf32> to vector<16x128xf32>
      %15 = arith.addf %12, %14 : vector<16x128xf32>
      %cst_14 = arith.constant 0.000000e+00 : f32
      %16 = vector.broadcast %cst_14 : f32 to vector<16x128xf32>
      %17 = arith.cmpf oge, %15, %16 : vector<16x128xf32>
      %cst_15 = arith.constant 2.000000e-01 : f32
      %18 = vector.broadcast %cst_15 : f32 to vector<16x128xf32>
      %19 = arith.mulf %18, %15 : vector<16x128xf32>
      %20 = arith.select %17, %15, %19 : vector<16x128xi1>, vector<16x128xf32>
      %21 = arith.truncf %20 : vector<16x128xf32> to vector<16x128xbf16>
      %c0_16 = arith.constant 0 : index
      %c0_17 = arith.constant 0 : index
      %22 = vector.load %arg6[%c0_16, %c0_17] : memref<16x128xbf16, #tpu.memory_space<vmem>>, vector<16x128xbf16>
      tpu.vector_store %arg6[%c0_16, %c0_17], %21 {strides = array<i32>} : memref<16x128xbf16, #tpu.memory_space<vmem>>, vector<16x128xbf16>,
    } else {
    }
    return
  }
  func.func @transform_0(%arg0: i32, %arg1: i32, %arg2: i32) -> (i32, i32) {
    %c0_i32 = arith.constant 0 : i32
    return %arg0, %arg2 : i32, i32
  }
  func.func @transform_1(%arg0: i32, %arg1: i32, %arg2: i32) -> (i32, i32) {
    %c0_i32 = arith.constant 0 : i32
    return %arg2, %arg1 : i32, i32
  }
  func.func @transform_2(%arg0: i32, %arg1: i32, %arg2: i32) -> (i32, i32) {
    %c0_i32 = arith.constant 0 : i32
    %c0_i32_0 = arith.constant 0 : i32
    return %c0_i32, %arg1 : i32, i32
  }
  func.func @transform_3(%arg0: i32, %arg1: i32, %arg2: i32) -> (i32, i32) {
    %c0_i32 = arith.constant 0 : i32
    return %arg0, %arg1 : i32, i32
  }
}

module attributes {stable_mosaic.version = 11 : i64} {
  func.func @_conv_matmul_kernel(%arg0: i32, %arg1: i32, %arg2: i32, %arg3: memref<16x512xbf16, #tpu.memory_space<vmem>>, %arg4: memref<512x128xbf16, #tpu.memory_space<vmem>>, %arg5: memref<1x128xf32, #tpu.memory_space<vmem>>, %arg6: memref<16x128xbf16, #tpu.memory_space<vmem>>, %arg7: memref<16x128xf32, #tpu.memory_space<vmem>>) attributes {dimension_semantics = [#tpu.dimension_semantics<parallel>, #tpu.dimension_semantics<parallel>, #tpu.dimension_semantics<arbitrary>], iteration_bounds = array<i64: 2, 1, 1>, scalar_prefetch = 0 : i64, scratch_operands = 1 : i64, tpu.core_type = #tpu.core_type<tc>, window_params = [{transform_indices = @transform_0, window_bounds = array<i64: 16, 512>}, {transform_indices = @transform_1, window_bounds = array<i64: 512, 128>}, {transform_indices = @transform_2, window_bounds = array<i64: 1, 128>}, {transform_indices = @transform_3, window_bounds = array<i64: 16, 128>}]} {
    %c0_i32 = arith.constant 0 : i32
    %0 = arith.cmpi eq, %arg2, %c0_i32 : i32
    %1 = arith.extui %0 : i1 to i32
    %c0_i32_0 = arith.constant 0 : i32
    %2 = arith.cmpi ne, %1, %c0_i32_0 : i32
    scf.if %2 {
      %cst_10 = arith.constant 0.000000e+00 : f32
      %12 = vector.broadcast %cst_10 : f32 to vector<16x128xf32>
      %c0_11 = arith.constant 0 : index
      %c0_12 = arith.constant 0 : index
      %13 = vector.load %arg7[%c0_11, %c0_12] : memref<16x128xf32, #tpu.memory_space<vmem>>, vector<16x128xf32>
      tpu.vector_store %arg7[%c0_11, %c0_12], %12 {strides = array<i32>} : memref<16x128xf32, #tpu.memory_space<vmem>>, vector<16x128xf32>,
    } else {
    }
    %c0 = arith.constant 0 : index
    %c0_1 = arith.constant 0 : index
    %3 = vector.load %arg7[%c0, %c0_1] : memref<16x128xf32, #tpu.memory_space<vmem>>, vector<16x128xf32>
    %c0_2 = arith.constant 0 : index
    %c0_3 = arith.constant 0 : index
    %4 = vector.load %arg3[%c0_2, %c0_3] : memref<16x512xbf16, #tpu.memory_space<vmem>>, vector<16x512xbf16>
    %c0_4 = arith.constant 0 : index
    %c0_5 = arith.constant 0 : index
    %5 = vector.load %arg4[%c0_4, %c0_5] : memref<512x128xbf16, #tpu.memory_space<vmem>>, vector<512x128xbf16>
    %cst = arith.constant dense<0.000000e+00> : vector<16x128xf32>
    %6 = tpu.matmul %4, %5, %cst {dimension_numbers = #tpu.dot_dimension_numbers<[1], [0], [0], [1], [0, 0, 1, 1], [], []>} : vector<16x512xbf16>, vector<512x128xbf16>, vector<16x128xf32> -> vector<16x128xf32>
    %7 = arith.addf %3, %6 : vector<16x128xf32>
    %c0_6 = arith.constant 0 : index
    %c0_7 = arith.constant 0 : index
    %8 = vector.load %arg7[%c0_6, %c0_7] : memref<16x128xf32, #tpu.memory_space<vmem>>, vector<16x128xf32>
    tpu.vector_store %arg7[%c0_6, %c0_7], %7 {strides = array<i32>} : memref<16x128xf32, #tpu.memory_space<vmem>>, vector<16x128xf32>,
    %c0_i32_8 = arith.constant 0 : i32
    %9 = arith.cmpi eq, %arg2, %c0_i32_8 : i32
    %10 = arith.extui %9 : i1 to i32
    %c0_i32_9 = arith.constant 0 : i32
    %11 = arith.cmpi ne, %10, %c0_i32_9 : i32
    scf.if %11 {
      %c0_10 = arith.constant 0 : index
      %c0_11 = arith.constant 0 : index
      %12 = vector.load %arg7[%c0_10, %c0_11] : memref<16x128xf32, #tpu.memory_space<vmem>>, vector<16x128xf32>
      %c0_12 = arith.constant 0 : index
      %c0_13 = arith.constant 0 : index
      %13 = vector.load %arg5[%c0_12, %c0_13] : memref<1x128xf32, #tpu.memory_space<vmem>>, vector<1x128xf32>
      %14 = vector.broadcast %13 : vector<1x128xf32> to vector<16x128xf32>
      %15 = arith.addf %12, %14 : vector<16x128xf32>
      %cst_14 = arith.constant 0.000000e+00 : f32
      %16 = vector.broadcast %cst_14 : f32 to vector<16x128xf32>
      %17 = arith.cmpf oge, %15, %16 : vector<16x128xf32>
      %cst_15 = arith.constant 2.000000e-01 : f32
      %18 = vector.broadcast %cst_15 : f32 to vector<16x128xf32>
      %19 = arith.mulf %18, %15 : vector<16x128xf32>
      %20 = arith.select %17, %15, %19 : vector<16x128xi1>, vector<16x128xf32>
      %21 = arith.truncf %20 : vector<16x128xf32> to vector<16x128xbf16>
      %c0_16 = arith.constant 0 : index
      %c0_17 = arith.constant 0 : index
      %22 = vector.load %arg6[%c0_16, %c0_17] : memref<16x128xbf16, #tpu.memory_space<vmem>>, vector<16x128xbf16>
      tpu.vector_store %arg6[%c0_16, %c0_17], %21 {strides = array<i32>} : memref<16x128xbf16, #tpu.memory_space<vmem>>, vector<16x128xbf16>,
    } else {
    }
    return
  }
  func.func @transform_0(%arg0: i32, %arg1: i32, %arg2: i32) -> (i32, i32) {
    %c0_i32 = arith.constant 0 : i32
    return %arg0, %arg2 : i32, i32
  }
  func.func @transform_1(%arg0: i32, %arg1: i32, %arg2: i32) -> (i32, i32) {
    %c0_i32 = arith.constant 0 : i32
    return %arg2, %arg1 : i32, i32
  }
  func.func @transform_2(%arg0: i32, %arg1: i32, %arg2: i32) -> (i32, i32) {
    %c0_i32 = arith.constant 0 : i32
    %c0_i32_0 = arith.constant 0 : i32
    return %c0_i32, %arg1 : i32, i32
  }
  func.func @transform_3(%arg0: i32, %arg1: i32, %arg2: i32) -> (i32, i32) {
    %c0_i32 = arith.constant 0 : i32
    return %arg0, %arg1 : i32, i32
  }
}

module attributes {stable_mosaic.version = 11 : i64} {
  func.func @_conv_matmul_kernel(%arg0: i32, %arg1: i32, %arg2: i32, %arg3: memref<16x1024xbf16, #tpu.memory_space<vmem>>, %arg4: memref<1024x128xbf16, #tpu.memory_space<vmem>>, %arg5: memref<1x128xf32, #tpu.memory_space<vmem>>, %arg6: memref<16x128xf32, #tpu.memory_space<vmem>>, %arg7: memref<16x128xf32, #tpu.memory_space<vmem>>) attributes {dimension_semantics = [#tpu.dimension_semantics<parallel>, #tpu.dimension_semantics<parallel>, #tpu.dimension_semantics<arbitrary>], iteration_bounds = array<i64: 1, 1, 1>, scalar_prefetch = 0 : i64, scratch_operands = 1 : i64, tpu.core_type = #tpu.core_type<tc>, window_params = [{transform_indices = @transform_0, window_bounds = array<i64: 16, 1024>}, {transform_indices = @transform_1, window_bounds = array<i64: 1024, 128>}, {transform_indices = @transform_2, window_bounds = array<i64: 1, 128>}, {transform_indices = @transform_3, window_bounds = array<i64: 16, 128>}]} {
    %c0_i32 = arith.constant 0 : i32
    %0 = arith.cmpi eq, %arg2, %c0_i32 : i32
    %1 = arith.extui %0 : i1 to i32
    %c0_i32_0 = arith.constant 0 : i32
    %2 = arith.cmpi ne, %1, %c0_i32_0 : i32
    scf.if %2 {
      %cst_10 = arith.constant 0.000000e+00 : f32
      %12 = vector.broadcast %cst_10 : f32 to vector<16x128xf32>
      %c0_11 = arith.constant 0 : index
      %c0_12 = arith.constant 0 : index
      %13 = vector.load %arg7[%c0_11, %c0_12] : memref<16x128xf32, #tpu.memory_space<vmem>>, vector<16x128xf32>
      tpu.vector_store %arg7[%c0_11, %c0_12], %12 {strides = array<i32>} : memref<16x128xf32, #tpu.memory_space<vmem>>, vector<16x128xf32>,
    } else {
    }
    %c0 = arith.constant 0 : index
    %c0_1 = arith.constant 0 : index
    %3 = vector.load %arg7[%c0, %c0_1] : memref<16x128xf32, #tpu.memory_space<vmem>>, vector<16x128xf32>
    %c0_2 = arith.constant 0 : index
    %c0_3 = arith.constant 0 : index
    %4 = vector.load %arg3[%c0_2, %c0_3] : memref<16x1024xbf16, #tpu.memory_space<vmem>>, vector<16x1024xbf16>
    %c0_4 = arith.constant 0 : index
    %c0_5 = arith.constant 0 : index
    %5 = vector.load %arg4[%c0_4, %c0_5] : memref<1024x128xbf16, #tpu.memory_space<vmem>>, vector<1024x128xbf16>
    %cst = arith.constant dense<0.000000e+00> : vector<16x128xf32>
    %6 = tpu.matmul %4, %5, %cst {dimension_numbers = #tpu.dot_dimension_numbers<[1], [0], [0], [1], [0, 0, 1, 1], [], []>} : vector<16x1024xbf16>, vector<1024x128xbf16>, vector<16x128xf32> -> vector<16x128xf32>
    %7 = arith.addf %3, %6 : vector<16x128xf32>
    %c0_6 = arith.constant 0 : index
    %c0_7 = arith.constant 0 : index
    %8 = vector.load %arg7[%c0_6, %c0_7] : memref<16x128xf32, #tpu.memory_space<vmem>>, vector<16x128xf32>
    tpu.vector_store %arg7[%c0_6, %c0_7], %7 {strides = array<i32>} : memref<16x128xf32, #tpu.memory_space<vmem>>, vector<16x128xf32>,
    %c0_i32_8 = arith.constant 0 : i32
    %9 = arith.cmpi eq, %arg2, %c0_i32_8 : i32
    %10 = arith.extui %9 : i1 to i32
    %c0_i32_9 = arith.constant 0 : i32
    %11 = arith.cmpi ne, %10, %c0_i32_9 : i32
    scf.if %11 {
      %c0_10 = arith.constant 0 : index
      %c0_11 = arith.constant 0 : index
      %12 = vector.load %arg7[%c0_10, %c0_11] : memref<16x128xf32, #tpu.memory_space<vmem>>, vector<16x128xf32>
      %c0_12 = arith.constant 0 : index
      %c0_13 = arith.constant 0 : index
      %13 = vector.load %arg5[%c0_12, %c0_13] : memref<1x128xf32, #tpu.memory_space<vmem>>, vector<1x128xf32>
      %14 = vector.broadcast %13 : vector<1x128xf32> to vector<16x128xf32>
      %15 = arith.addf %12, %14 : vector<16x128xf32>
      %16 = math.absf %15 : vector<16x128xf32>
      %cst_14 = arith.constant 0.000000e+00 : f32
      %17 = vector.broadcast %cst_14 : f32 to vector<16x128xf32>
      %18 = arith.subf %17, %16 : vector<16x128xf32>
      %19 = math.exp %18 : vector<16x128xf32>
      %cst_15 = arith.constant 1.000000e+00 : f32
      %20 = vector.broadcast %cst_15 : f32 to vector<16x128xf32>
      %21 = arith.addf %20, %19 : vector<16x128xf32>
      %cst_16 = arith.constant 1.000000e+00 : f32
      %22 = vector.broadcast %cst_16 : f32 to vector<16x128xf32>
      %23 = arith.divf %22, %21 : vector<16x128xf32>
      %cst_17 = arith.constant 0.000000e+00 : f32
      %24 = vector.broadcast %cst_17 : f32 to vector<16x128xf32>
      %25 = arith.cmpf oge, %15, %24 : vector<16x128xf32>
      %26 = arith.mulf %19, %23 : vector<16x128xf32>
      %27 = arith.select %25, %23, %26 : vector<16x128xi1>, vector<16x128xf32>
      %c0_18 = arith.constant 0 : index
      %c0_19 = arith.constant 0 : index
      %28 = vector.load %arg6[%c0_18, %c0_19] : memref<16x128xf32, #tpu.memory_space<vmem>>, vector<16x128xf32>
      tpu.vector_store %arg6[%c0_18, %c0_19], %27 {strides = array<i32>} : memref<16x128xf32, #tpu.memory_space<vmem>>, vector<16x128xf32>,
    } else {
    }
    return
  }
  func.func @transform_0(%arg0: i32, %arg1: i32, %arg2: i32) -> (i32, i32) {
    %c0_i32 = arith.constant 0 : i32
    return %arg0, %arg2 : i32, i32
  }
  func.func @transform_1(%arg0: i32, %arg1: i32, %arg2: i32) -> (i32, i32) {
    %c0_i32 = arith.constant 0 : i32
    return %arg2, %arg1 : i32, i32
  }
  func.func @transform_2(%arg0: i32, %arg1: i32, %arg2: i32) -> (i32, i32) {
    %c0_i32 = arith.constant 0 : i32
    %c0_i32_0 = arith.constant 0 : i32
    return %c0_i32, %arg1 : i32, i32
  }
  func.func @transform_3(%arg0: i32, %arg1: i32, %arg2: i32) -> (i32, i32) {
    %c0_i32 = arith.constant 0 : i32
    return %arg0, %arg1 : i32, i32
  }
}

</mosaic_0001>

<bundles_post_ra>
// kernel: discriminator_forward.5
= control target key start
LH: loop header
LB: loop body
LE: loop exit
PB: predicated region body
PF: predicated region fallthrough
CT: control target
= control target key end

     0   :  { %s1563_s12 = smov 0   ;;  %s1565_s13 = smov 0   ;;  %s1704_s0 = inlined_call_operand.vmem [shape: bf16[512,128], index: 0, kind: input, shape index: {}]   ;;  %s1705_s1 = inlined_call_operand.vmem [shape: bf16[128,128], index: 1, kind: input, shape index: {}]   ;;  %s1706_s2 = inlined_call_operand.vmem [shape: f32[1,128], index: 2, kind: input, shape index: {}]   ;;  %s1707_s3 = inlined_call_operand.vmem [shape: bf16[512,128], index: 3, kind: output, shape index: {}]  }
   0x1   :  { %s1567_s14 = smov 0  }
   0x2 LB: > { %s32_s15 = sadd.s32 1, %s1537_s13  ;;  %p1192_p0 = scmp.ge.s32.totalorder %s1541_s14, 1  ;;  %s1541_s14 = sphi %s1567_s14, %s13_s14   ;;  %s1537_s13 = sphi %s1565_s13, %s1709_s13   ;;  %s1533_s12 = sphi %s1563_s12, %s1708_s12  }
   0x3   : > { %p34_p1 = scmp.ge.s32.totalorder %s32_s15, 2  ;;  %p188_p2 = scmp.lt.s32.totalorder %s1541_s14, 3 }
   0x5   : > { %s1711_s15 = smov (%p34_p1, %s32_s15), 0  ;;  %p189_p3 = pnand %p1192_p0, %p188_p2 }
   0x6   : > { %s1193_s18 = sshll.u32 (!%p189_p3), %s1533_s12, 5 }
   0x7   : > { %192 = sbr.rel (%p189_p3) target bundleno = 280 (0x118), region = 32  ;;  %p230_p4 = scmp.lt.s32.totalorder (!%p189_p3), %s1193_s18, 63 }
   0xc   : > { %v1495_v0 = vld [vmem:[%s1705_s1 + $0x38] sm:$0xff]   ;;  %v1496_v1 = vld [vmem:[%s1705_s1 + $0x30] sm:$0xff]   ;;  %s1713_s18 = smov (!%p230_p4, %s1193_s18), 63  ;;  %v1497_v2 = vld [vmem:[%s1705_s1 + $0x28] sm:$0xff]  }
   0xd   : > { %1407 = vmatprep.subr.bf16.mxu0 %v1495_v0  ;;  %1455 = vmatprep.subr.bf16.mxu1 %v1495_v0  ;;  %s1194_s23 = sshll.u32 %s1713_s18, 2  ;;  %v1498_v3 = vld [vmem:[%s1705_s1 + $0x20] sm:$0xff]   ;;  %v1499_v6 = vld [vmem:[%s1705_s1 + $0x18] sm:$0xff]   ;;  %v1500_v7 = vld [vmem:[%s1705_s1 + $0x10] sm:$0xff]  }
   0xe   : > { %1408 = vmatpush3.bf16.msra.mxu0 %v1495_v0  ;;  %1463 = vmatpush3.bf16.msra.mxu1 %v1495_v0  ;;  %s1598_s26 = scalar_lea.vmem %s1704_s0, %s1194_s23  ;;  %v1501_v8 = vld [vmem:[%s1705_s1 + $0x8] sm:$0xff]   ;;  %v1502_v9 = vld [vmem:[%s1705_s1] sm:$0xff]   ;;  %s1649_s17 = scalar_lea.vmem %s1707_s3, %s1194_s23 }
   0xf   : > { %1409 = vmatprep.subr.bf16.mxu0 %v1496_v1  ;;  %1456 = vmatprep.subr.bf16.mxu1 %v1496_v1  ;;  %v1503_v4 = vld [vmem:[%s1598_s26] sm:$0xff]   ;;  %v1505_v10 = vld [vmem:[%s1598_s26 + $0x8] sm:$0xff]   ;;  %v1507_v12 = vld [vmem:[%s1598_s26 + $0x10] sm:$0xff]  }
  0x10   : > { %v1504_v5 = vld [vmem:[%s1598_s26 + $0x40] sm:$0xff]   ;;  %1423 = vmatprep.mubr.bf16.mxu0 %v1503_v4  ;;  %v1506_v11 = vld [vmem:[%s1598_s26 + $0x48] sm:$0xff]   ;;  %v1508_v13 = vld [vmem:[%s1598_s26 + $0x50] sm:$0xff]  }
  0x11   : > { %1439 = vmatprep.mubr.bf16.mxu1 %v1504_v5  ;;  %v1509_v14 = vld [vmem:[%s1598_s26 + $0x18] sm:$0xff]   ;;  %v1511_v16 = vld [vmem:[%s1598_s26 + $0x20] sm:$0xff]   ;;  %v1513_v18 = vld [vmem:[%s1598_s26 + $0x28] sm:$0xff]  }
  0x12   : > { %1410 = vmatpush3.bf16.msra.mxu0 %v1496_v1  ;;  %1464 = vmatpush3.bf16.msra.mxu1 %v1496_v1  ;;  %v1510_v15 = vld [vmem:[%s1598_s26 + $0x58] sm:$0xff]   ;;  %v1512_v17 = vld [vmem:[%s1598_s26 + $0x60] sm:$0xff]   ;;  %v1514_v19 = vld [vmem:[%s1598_s26 + $0x68] sm:$0xff]  }
  0x13   : > { %1411 = vmatprep.subr.bf16.mxu0 %v1497_v2  ;;  %1457 = vmatprep.subr.bf16.mxu1 %v1497_v2  ;;  %v1515_v20 = vld [vmem:[%s1598_s26 + $0x30] sm:$0xff]   ;;  %v1517_v22 = vld [vmem:[%s1598_s26 + $0x38] sm:$0xff]   ;;  %v1634_v24 = vld [vmem:[%s1706_s2] ss:$0 sm:$0xff] }
  0x14   : > { %v1516_v21 = vld [vmem:[%s1598_s26 + $0x70] sm:$0xff]   ;;  %v1518_v23 = vld [vmem:[%s1598_s26 + $0x78] sm:$0xff]  }
  0x16   : > { %1412 = vmatpush3.bf16.msra.mxu0 %v1497_v2  ;;  %1465 = vmatpush3.bf16.msra.mxu1 %v1497_v2 }
  0x17   : > { %1413 = vmatprep.subr.bf16.mxu0 %v1498_v3  ;;  %1458 = vmatprep.subr.bf16.mxu1 %v1498_v3 }
  0x1a   : > { %1414 = vmatpush3.bf16.msra.mxu0 %v1498_v3  ;;  %1466 = vmatpush3.bf16.msra.mxu1 %v1498_v3 }
  0x1b   : > { %1415 = vmatprep.subr.bf16.mxu0 %v1499_v6  ;;  %1459 = vmatprep.subr.bf16.mxu1 %v1499_v6 }
  0x1e   : > { %1416 = vmatpush3.bf16.msra.mxu0 %v1499_v6  ;;  %1467 = vmatpush3.bf16.msra.mxu1 %v1499_v6 }
  0x1f   : > { %1417 = vmatprep.subr.bf16.mxu0 %v1500_v7  ;;  %1460 = vmatprep.subr.bf16.mxu1 %v1500_v7 }
  0x22   : > { %1418 = vmatpush3.bf16.msra.mxu0 %v1500_v7  ;;  %1468 = vmatpush3.bf16.msra.mxu1 %v1500_v7 }
  0x23   : > { %1419 = vmatprep.subr.bf16.mxu0 %v1501_v8  ;;  %1461 = vmatprep.subr.bf16.mxu1 %v1501_v8 }
  0x26   : > { %1420 = vmatpush3.bf16.msra.mxu0 %v1501_v8  ;;  %1469 = vmatpush3.bf16.msra.mxu1 %v1501_v8 }
  0x27   : > { %1421 = vmatprep.subr.bf16.mxu0 %v1502_v9  ;;  %1462 = vmatprep.subr.bf16.mxu1 %v1502_v9 }
  0x2a   : > { %1422 = vmatpush3.bf16.msra.mxu0 %v1502_v9  ;;  %1470 = vmatpush3.bf16.msra.mxu1 %v1502_v9 }
  0x2d   : > { %1424 = vmatmul.mubr.bf16.vlgmr.msra.gmra.mxu0 %v1505_v10  ;;  %1440 = vmatmul.mubr.bf16.vlgmr.msra.gmra.mxu1 %v1506_v11 }
  0x2e   : > { %1427 = vmatprep.mubr.bf16.mxu0 %v1507_v12  ;;  %1443 = vmatprep.mubr.bf16.mxu1 %v1508_v13 }
  0x35   : > { %1428 = vmatmul.mubr.bf16.gmra.mxu0 %v1509_v14  ;;  %1444 = vmatmul.mubr.bf16.gmra.mxu1 %v1510_v15 }
  0x36   : > { %1431 = vmatprep.mubr.bf16.mxu0 %v1511_v16  ;;  %1447 = vmatprep.mubr.bf16.mxu1 %v1512_v17 }
  0x3d   : > { %1432 = vmatmul.mubr.bf16.gmra.mxu0 %v1513_v18  ;;  %1448 = vmatmul.mubr.bf16.gmra.mxu1 %v1514_v19 }
  0x3e   : > { %1435 = vmatprep.mubr.bf16.mxu0 %v1515_v20  ;;  %1451 = vmatprep.mubr.bf16.mxu1 %v1516_v21 }
  0x45   : > { %1436 = vmatmul.mubr.bf16.gmra.mxu0 %v1517_v22  ;;  %1452 = vmatmul.mubr.bf16.gmra.mxu1 %v1518_v23 }
  0xed   : > { %v1425_v25 = vpop.f32.mrf.mxu0  ;;  %v1441_v26 = vpop.f32.mrf.mxu1 }
  0xee   : > { %v789_v27 = vadd.f32 %v1425_v25, %v1634_v24  ;;  %v805_v28 = vadd.f32 %v1441_v26, %v1634_v24 }
  0xef   : > { %v554_v29 = vpop.f32.mrf.mxu0  ;;  %v618_v30 = vpop.f32.mrf.mxu1 }
  0xf0   : > { %vm821_vm0 = vcmp.ge.f32.partialorder %v789_v27, 0.0  ;;  %v853_v31 = vmul.f32 0.2, %v789_v27  ;;  %vm837_vm1 = vcmp.ge.f32.partialorder %v805_v28, 0.0  ;;  %v869_v32 = vmul.f32 0.2, %v805_v28 }
  0xf1   : > { %v787_v33 = vadd.f32 %v1634_v24, %v554_v29  ;;  %v803_v34 = vadd.f32 %v1634_v24, %v618_v30  ;;  %v1426_v35 = vpop.f32.mrf.mxu0  ;;  %v1442_v36 = vpop.f32.mrf.mxu1 }
  0xf2   : > { %v885_v37 = vsel %vm821_vm0, %v789_v27, %v853_v31  ;;  %v790_v38 = vadd.f32 %v1426_v35, %v1634_v24  ;;  %v806_v39 = vadd.f32 %v1442_v36, %v1634_v24  ;;  %v901_v40 = vsel %vm837_vm1, %v805_v28, %v869_v32 }
  0xf3   : > { %vm819_vm2 = vcmp.ge.f32.partialorder %v787_v33, 0.0  ;;  %v851_v41 = vmul.f32 0.2, %v787_v33  ;;  %vm835_vm3 = vcmp.ge.f32.partialorder %v803_v34, 0.0  ;;  %v557_v42 = vpop.f32.mrf.mxu0  ;;  %v621_v43 = vpop.f32.mrf.mxu1  ;;  %v867_v47 = vmul.f32 0.2, %v803_v34 }
  0xf4   : > { %vm822_vm4 = vcmp.ge.f32.partialorder %v790_v38, 0.0  ;;  %v854_v44 = vmul.f32 0.2, %v790_v38  ;;  %vm838_vm5 = vcmp.ge.f32.partialorder %v806_v39, 0.0  ;;  %v870_v45 = vmul.f32 0.2, %v806_v39 }
  0xf5   : > { %v883_v46 = vsel %vm819_vm2, %v787_v33, %v851_v41  ;;  %v788_v48 = vadd.f32 %v1634_v24, %v557_v42  ;;  %v804_v49 = vadd.f32 %v1634_v24, %v621_v43  ;;  %v1429_v50 = vpop.f32.mrf.mxu0  ;;  %v1445_v51 = vpop.f32.mrf.mxu1  ;;  %v899_v63 = vsel %vm835_vm3, %v803_v34, %v867_v47 }
  0xf6   : > { %v886_v52 = vsel %vm822_vm4, %v790_v38, %v854_v44  ;;  %v902_v53 = vsel %vm838_vm5, %v806_v39, %v870_v45  ;;  %v793_v54 = vadd.f32 %v1429_v50, %v1634_v24  ;;  %v809_v55 = vadd.f32 %v1445_v51, %v1634_v24 }
  0xf7   : > { %v1296_v56 = vpack.c.bf16 %v886_v52, %v885_v37  ;;  %v1336_v57 = vpack.c.bf16 %v902_v53, %v901_v40  ;;  %vm820_vm6 = vcmp.ge.f32.partialorder %v788_v48, 0.0  ;;  %v852_v58 = vmul.f32 0.2, %v788_v48  ;;  %v570_v59 = vpop.f32.mrf.mxu0  ;;  %v634_v60 = vpop.f32.mrf.mxu1 }
  0xf8   : > { %vm836_vm7 = vcmp.ge.f32.partialorder %v804_v49, 0.0  ;;  %v868_v61 = vmul.f32 0.2, %v804_v49  ;;  %vm825_vm8 = vcmp.ge.f32.partialorder %v793_v54, 0.0  ;;  %v857_v62 = vmul.f32 0.2, %v793_v54 }
  0xf9   : > { %1368 = vst [vmem:[%s1649_s17 + $0x8] sm:$0xff] %v1296_v56   ;;  %1376 = vst [vmem:[%s1649_s17 + $0x48] sm:$0xff] %v1336_v57   ;;  %v884_v0 = vsel %vm820_vm6, %v788_v48, %v852_v58  ;;  %v873_v1 = vmul.f32 0.2, %v809_v55  ;;  %v791_v2 = vadd.f32 %v1634_v24, %v570_v59  ;;  %v1430_v3 = vpop.f32.mrf.mxu0  ;;  %v1446_v4 = vpop.f32.mrf.mxu1  ;;  %vm841_vm9 = vcmp.ge.f32.partialorder %v809_v55, 0.0 }
  0xfa   : > { %v1291_v5 = vpack.c.bf16 %v884_v0, %v883_v46  ;;  %v900_v6 = vsel %vm836_vm7, %v804_v49, %v868_v61  ;;  %v807_v7 = vadd.f32 %v1634_v24, %v634_v60  ;;  %v889_v9 = vsel %vm825_vm8, %v793_v54, %v857_v62 }
  0xfb   : > { %v1331_v8 = vpack.c.bf16 %v900_v6, %v899_v63  ;;  %vm823_vm10 = vcmp.ge.f32.partialorder %v791_v2, 0.0  ;;  %v855_v10 = vmul.f32 0.2, %v791_v2  ;;  %v573_v11 = vpop.f32.mrf.mxu0  ;;  %v637_v12 = vpop.f32.mrf.mxu1  ;;  %v794_v14 = vadd.f32 %v1430_v3, %v1634_v24 }
  0xfc   : > { %1292 = vst [vmem:[%s1649_s17] sm:$0xff] %v1291_v5   ;;  %vm839_vm11 = vcmp.ge.f32.partialorder %v807_v7, 0.0  ;;  %v871_v13 = vmul.f32 0.2, %v807_v7  ;;  %v810_v15 = vadd.f32 %v1446_v4, %v1634_v24  ;;  %v905_v16 = vsel %vm841_vm9, %v809_v55, %v873_v1 }
  0xfd   : > { %1375 = vst [vmem:[%s1649_s17 + $0x40] sm:$0xff] %v1331_v8   ;;  %v887_v17 = vsel %vm823_vm10, %v791_v2, %v855_v10  ;;  %v792_v18 = vadd.f32 %v1634_v24, %v573_v11  ;;  %v808_v19 = vadd.f32 %v1634_v24, %v637_v12  ;;  %v1433_v20 = vpop.f32.mrf.mxu0  ;;  %v1449_v21 = vpop.f32.mrf.mxu1  ;;  %vm826_vm12 = vcmp.ge.f32.partialorder %v794_v14, 0.0 }
  0xfe   : > { %v903_v22 = vsel %vm839_vm11, %v807_v7, %v871_v13  ;;  %v858_v23 = vmul.f32 0.2, %v794_v14  ;;  %vm842_vm13 = vcmp.ge.f32.partialorder %v810_v15, 0.0  ;;  %v874_v25 = vmul.f32 0.2, %v810_v15 }
  0xff   : > { %vm824_vm14 = vcmp.ge.f32.partialorder %v792_v18, 0.0  ;;  %v856_v26 = vmul.f32 0.2, %v792_v18  ;;  %vm840_vm15 = vcmp.ge.f32.partialorder %v808_v19, 0.0  ;;  %v586_v27 = vpop.f32.mrf.mxu0  ;;  %v650_v28 = vpop.f32.mrf.mxu1  ;;  %v872_v30 = vmul.f32 0.2, %v808_v19 }
 0x100   : > { %v890_v29 = vsel %vm826_vm12, %v794_v14, %v858_v23  ;;  %v797_v31 = vadd.f32 %v1433_v20, %v1634_v24  ;;  %v813_v32 = vadd.f32 %v1449_v21, %v1634_v24  ;;  %v906_v34 = vsel %vm842_vm13, %v810_v15, %v874_v25 }
 0x101   : > { %v1306_v33 = vpack.c.bf16 %v890_v29, %v889_v9  ;;  %v888_v35 = vsel %vm824_vm14, %v792_v18, %v856_v26  ;;  %v795_v36 = vadd.f32 %v1634_v24, %v586_v27  ;;  %v1434_v37 = vpop.f32.mrf.mxu0  ;;  %v1450_v38 = vpop.f32.mrf.mxu1  ;;  %v1346_v39 = vpack.c.bf16 %v906_v34, %v905_v16 }
 0x102   : > { %v1301_v40 = vpack.c.bf16 %v888_v35, %v887_v17  ;;  %v904_v41 = vsel %vm840_vm15, %v808_v19, %v872_v30  ;;  %vm829_vm0 = vcmp.ge.f32.partialorder %v797_v31, 0.0  ;;  %v861_v43 = vmul.f32 0.2, %v797_v31 }
 0x103   : > { %1370 = vst [vmem:[%s1649_s17 + $0x18] sm:$0xff] %v1306_v33   ;;  %v1341_v42 = vpack.c.bf16 %v904_v41, %v903_v22  ;;  %vm845_vm1 = vcmp.ge.f32.partialorder %v813_v32, 0.0  ;;  %v877_v44 = vmul.f32 0.2, %v813_v32  ;;  %v589_v45 = vpop.f32.mrf.mxu0  ;;  %v653_v46 = vpop.f32.mrf.mxu1  ;;  %1378 = vst [vmem:[%s1649_s17 + $0x58] sm:$0xff] %v1346_v39   ;;  %vm827_vm2 = vcmp.ge.f32.partialorder %v795_v36, 0.0 }
 0x104   : > { %1369 = vst [vmem:[%s1649_s17 + $0x10] sm:$0xff] %v1301_v40   ;;  %v859_v47 = vmul.f32 0.2, %v795_v36  ;;  %v811_v48 = vadd.f32 %v1634_v24, %v650_v28  ;;  %v798_v49 = vadd.f32 %v1434_v37, %v1634_v24  ;;  %v893_v50 = vsel %vm829_vm0, %v797_v31, %v861_v43 }
 0x105   : > { %1377 = vst [vmem:[%s1649_s17 + $0x50] sm:$0xff] %v1341_v42   ;;  %v814_v51 = vadd.f32 %v1450_v38, %v1634_v24  ;;  %v796_v52 = vadd.f32 %v1634_v24, %v589_v45  ;;  %v1437_v53 = vpop.f32.mrf.mxu0  ;;  %v1453_v54 = vpop.f32.mrf.mxu1  ;;  %v909_v55 = vsel %vm845_vm1, %v813_v32, %v877_v44  ;;  %v812_v63 = vadd.f32 %v1634_v24, %v653_v46 }
 0x106   : > { %v891_v56 = vsel %vm827_vm2, %v795_v36, %v859_v47  ;;  %vm843_vm3 = vcmp.ge.f32.partialorder %v811_v48, 0.0  ;;  %vm830_vm4 = vcmp.ge.f32.partialorder %v798_v49, 0.0  ;;  %v862_v57 = vmul.f32 0.2, %v798_v49 }
 0x107   : > { %vm846_vm5 = vcmp.ge.f32.partialorder %v814_v51, 0.0  ;;  %v878_v58 = vmul.f32 0.2, %v814_v51  ;;  %vm828_vm6 = vcmp.ge.f32.partialorder %v796_v52, 0.0  ;;  %v602_v59 = vpop.f32.mrf.mxu0  ;;  %v666_v60 = vpop.f32.mrf.mxu1  ;;  %v875_v61 = vmul.f32 0.2, %v811_v48 }
 0x108   : > { %v860_v62 = vmul.f32 0.2, %v796_v52  ;;  %v801_v0 = vadd.f32 %v1437_v53, %v1634_v24  ;;  %v894_v1 = vsel %vm830_vm4, %v798_v49, %v862_v57  ;;  %v817_v3 = vadd.f32 %v1453_v54, %v1634_v24 }
 0x109   : > { %v910_v2 = vsel %vm846_vm5, %v814_v51, %v878_v58  ;;  %v799_v4 = vadd.f32 %v1634_v24, %v602_v59  ;;  %v1438_v5 = vpop.f32.mrf.mxu0  ;;  %v1454_v6 = vpop.f32.mrf.mxu1  ;;  %v1316_v7 = vpack.c.bf16 %v894_v1, %v893_v50  ;;  %vm844_vm7 = vcmp.ge.f32.partialorder %v812_v63, 0.0 }
 0x10a   : > { %v1356_v8 = vpack.c.bf16 %v910_v2, %v909_v55  ;;  %v892_v9 = vsel %vm828_vm6, %v796_v52, %v860_v62  ;;  %v876_v11 = vmul.f32 0.2, %v812_v63  ;;  %v865_v12 = vmul.f32 0.2, %v801_v0 }
 0x10b   : > { %v1311_v10 = vpack.c.bf16 %v892_v9, %v891_v56  ;;  %v907_v13 = vsel %vm843_vm3, %v811_v48, %v875_v61  ;;  %1372 = vst [vmem:[%s1649_s17 + $0x28] sm:$0xff] %v1316_v7   ;;  %vm833_vm8 = vcmp.ge.f32.partialorder %v801_v0, 0.0  ;;  %v881_v15 = vmul.f32 0.2, %v817_v3  ;;  %v605_v18 = vpop.f32.mrf.mxu0  ;;  %v669_v19 = vpop.f32.mrf.mxu1 }
 0x10c   : > { %1380 = vst [vmem:[%s1649_s17 + $0x68] sm:$0xff] %v1356_v8   ;;  %v908_v14 = vsel %vm844_vm7, %v812_v63, %v876_v11  ;;  %v815_v16 = vadd.f32 %v1634_v24, %v666_v60  ;;  %v802_v17 = vadd.f32 %v1438_v5, %v1634_v24  ;;  %vm849_vm9 = vcmp.ge.f32.partialorder %v817_v3, 0.0 }
 0x10d   : > { %1371 = vst [vmem:[%s1649_s17 + $0x20] sm:$0xff] %v1311_v10   ;;  %v1351_v20 = vpack.c.bf16 %v908_v14, %v907_v13  ;;  %vm831_vm10 = vcmp.ge.f32.partialorder %v799_v4, 0.0  ;;  %v818_v21 = vadd.f32 %v1454_v6, %v1634_v24  ;;  %v897_v22 = vsel %vm833_vm8, %v801_v0, %v865_v12 }
 0x10e   : > { %v863_v23 = vmul.f32 0.2, %v799_v4  ;;  %vm834_vm11 = vcmp.ge.f32.partialorder %v802_v17, 0.0  ;;  %v866_v25 = vmul.f32 0.2, %v802_v17  ;;  %v800_v27 = vadd.f32 %v1634_v24, %v605_v18 }
 0x10f   : > { %1379 = vst [vmem:[%s1649_s17 + $0x60] sm:$0xff] %v1351_v20   ;;  %vm850_vm12 = vcmp.ge.f32.partialorder %v818_v21, 0.0  ;;  %v882_v26 = vmul.f32 0.2, %v818_v21  ;;  %v816_v28 = vadd.f32 %v1634_v24, %v669_v19  ;;  %v913_v29 = vsel %vm849_vm9, %v817_v3, %v881_v15 }
 0x110   : > { %vm847_vm13 = vcmp.ge.f32.partialorder %v815_v16, 0.0  ;;  %v879_v30 = vmul.f32 0.2, %v815_v16  ;;  %v898_v31 = vsel %vm834_vm11, %v802_v17, %v866_v25  ;;  %vm832_vm14 = vcmp.ge.f32.partialorder %v800_v27, 0.0 }
 0x111   : > { %v1326_v32 = vpack.c.bf16 %v898_v31, %v897_v22  ;;  %v914_v33 = vsel %vm850_vm12, %v818_v21, %v882_v26  ;;  %v864_v34 = vmul.f32 0.2, %v800_v27  ;;  %vm848_vm15 = vcmp.ge.f32.partialorder %v816_v28, 0.0 }
 0x112   : > { %v1366_v35 = vpack.c.bf16 %v914_v33, %v913_v29  ;;  %v880_v36 = vmul.f32 0.2, %v816_v28  ;;  %v895_v37 = vsel %vm831_vm10, %v799_v4, %v863_v23  ;;  %v911_v39 = vsel %vm847_vm13, %v815_v16, %v879_v30 }
 0x113   : > { %1374 = vst [vmem:[%s1649_s17 + $0x38] sm:$0xff] %v1326_v32   ;;  %v896_v38 = vsel %vm832_vm14, %v800_v27, %v864_v34 }
 0x114   : > { %1382 = vst [vmem:[%s1649_s17 + $0x78] sm:$0xff] %v1366_v35   ;;  %v1321_v24 = vpack.c.bf16 %v896_v38, %v895_v37  ;;  %v912_v40 = vsel %vm848_vm15, %v816_v28, %v880_v36 }
 0x115   : > { %v1361_v41 = vpack.c.bf16 %v912_v40, %v911_v39 }
 0x116   : > { %1373 = vst [vmem:[%s1649_s17 + $0x30] sm:$0xff] %v1321_v24  }
 0x117   : > { %1381 = vst [vmem:[%s1649_s17 + $0x70] sm:$0xff] %v1361_v41  }
 0x118 PF: > { %s13_s14 = sadd.s32 1, %s1541_s14   ;;  %s1708_s12 = smov %s1537_s13 }
 0x119   : > { %p10_p5 = scmp.ge.s32.totalorder %s13_s14, 4   ;;  %s1709_s13 = smov %s1711_s15 }
 0x11b   :  { %12 = sbr.rel (!%p10_p5) target bundleno = 2 (0x2), region = 76 }

// kernel: discriminator_forward.6
= control target key start
LH: loop header
LB: loop body
LE: loop exit
PB: predicated region body
PF: predicated region fallthrough
CT: control target
= control target key end

     0   :  { %s855_s12 = smov 0   ;;  %s857_s13 = smov 0   ;;  %s928_s0 = inlined_call_operand.vmem [shape: bf16[128,128], index: 0, kind: input, shape index: {}]   ;;  %s929_s1 = inlined_call_operand.vmem [shape: bf16[128,128], index: 1, kind: input, shape index: {}]   ;;  %s930_s2 = inlined_call_operand.vmem [shape: f32[1,128], index: 2, kind: input, shape index: {}]   ;;  %s931_s3 = inlined_call_operand.vmem [shape: bf16[128,128], index: 3, kind: output, shape index: {}]  }
   0x1   :  { %s859_s14 = smov 0  }
   0x2 LB: > { %s32_s15 = sadd.s32 1, %s829_s13  ;;  %p664_p0 = scmp.ge.s32.totalorder %s833_s14, 1  ;;  %s833_s14 = sphi %s859_s14, %s13_s14   ;;  %s829_s13 = sphi %s857_s13, %s933_s13   ;;  %s825_s12 = sphi %s855_s12, %s932_s12  }
   0x3   : > { %p34_p1 = scmp.ge.s32.totalorder %s32_s15, 2  ;;  %p188_p2 = scmp.lt.s32.totalorder %s833_s14, 3 }
   0x5   : > { %s935_s15 = smov (%p34_p1, %s32_s15), 0  ;;  %p189_p3 = pnand %p664_p0, %p188_p2 }
   0x6   : > { %s665_s18 = sshll.u32 (!%p189_p3), %s825_s12, 3 }
   0x7   : > { %192 = sbr.rel (%p189_p3) target bundleno = 254 (0xfe), region = 32  ;;  %p230_p4 = scmp.lt.s32.totalorder (!%p189_p3), %s665_s18, 15 }
   0xc   : > { %v799_v0 = vld [vmem:[%s929_s1 + $0x38] sm:$0xff]   ;;  %v800_v1 = vld [vmem:[%s929_s1 + $0x30] sm:$0xff]   ;;  %s937_s18 = smov (!%p230_p4, %s665_s18), 15  ;;  %v801_v2 = vld [vmem:[%s929_s1 + $0x28] sm:$0xff]  }
   0xd   : > { %735 = vmatprep.subr.bf16.mxu0 %v799_v0  ;;  %759 = vmatprep.subr.bf16.mxu1 %v799_v0  ;;  %s666_s23 = sshll.u32 %s937_s18, 2  ;;  %v802_v3 = vld [vmem:[%s929_s1 + $0x20] sm:$0xff]   ;;  %v803_v6 = vld [vmem:[%s929_s1 + $0x18] sm:$0xff]   ;;  %v804_v7 = vld [vmem:[%s929_s1 + $0x10] sm:$0xff]  }
   0xe   : > { %736 = vmatpush3.bf16.msra.mxu0 %v799_v0  ;;  %767 = vmatpush3.bf16.msra.mxu1 %v799_v0  ;;  %s890_s26 = scalar_lea.vmem %s928_s0, %s666_s23  ;;  %v805_v8 = vld [vmem:[%s929_s1 + $0x8] sm:$0xff]   ;;  %v806_v9 = vld [vmem:[%s929_s1] sm:$0xff]   ;;  %s257_s17 = scalar_lea.vmem %s931_s3, %s666_s23 }
   0xf   : > { %737 = vmatprep.subr.bf16.mxu0 %v800_v1  ;;  %760 = vmatprep.subr.bf16.mxu1 %v800_v1  ;;  %v807_v4 = vld [vmem:[%s890_s26] sm:$0xff]   ;;  %v808_v5 = vld [vmem:[%s890_s26 + $0x10] sm:$0xff]   ;;  %v809_v10 = vld [vmem:[%s890_s26 + $0x8] sm:$0xff]  }
  0x10   : > { %751 = vmatprep.mubr.bf16.mxu0 %v807_v4  ;;  %755 = vmatprep.mubr.bf16.mxu1 %v808_v5  ;;  %v810_v11 = vld [vmem:[%s890_s26 + $0x18] sm:$0xff]   ;;  %v681_v12 = vld [vmem:[%s930_s2] ss:$0 sm:$0xff] }
  0x12   : > { %738 = vmatpush3.bf16.msra.mxu0 %v800_v1  ;;  %768 = vmatpush3.bf16.msra.mxu1 %v800_v1 }
  0x13   : > { %739 = vmatprep.subr.bf16.mxu0 %v801_v2  ;;  %761 = vmatprep.subr.bf16.mxu1 %v801_v2 }
  0x16   : > { %740 = vmatpush3.bf16.msra.mxu0 %v801_v2  ;;  %769 = vmatpush3.bf16.msra.mxu1 %v801_v2 }
  0x17   : > { %741 = vmatprep.subr.bf16.mxu0 %v802_v3  ;;  %762 = vmatprep.subr.bf16.mxu1 %v802_v3 }
  0x1a   : > { %742 = vmatpush3.bf16.msra.mxu0 %v802_v3  ;;  %770 = vmatpush3.bf16.msra.mxu1 %v802_v3 }
  0x1b   : > { %743 = vmatprep.subr.bf16.mxu0 %v803_v6  ;;  %763 = vmatprep.subr.bf16.mxu1 %v803_v6 }
  0x1e   : > { %744 = vmatpush3.bf16.msra.mxu0 %v803_v6  ;;  %771 = vmatpush3.bf16.msra.mxu1 %v803_v6 }
  0x1f   : > { %745 = vmatprep.subr.bf16.mxu0 %v804_v7  ;;  %764 = vmatprep.subr.bf16.mxu1 %v804_v7 }
  0x22   : > { %746 = vmatpush3.bf16.msra.mxu0 %v804_v7  ;;  %772 = vmatpush3.bf16.msra.mxu1 %v804_v7 }
  0x23   : > { %747 = vmatprep.subr.bf16.mxu0 %v805_v8  ;;  %765 = vmatprep.subr.bf16.mxu1 %v805_v8 }
  0x26   : > { %748 = vmatpush3.bf16.msra.mxu0 %v805_v8  ;;  %773 = vmatpush3.bf16.msra.mxu1 %v805_v8 }
  0x27   : > { %749 = vmatprep.subr.bf16.mxu0 %v806_v9  ;;  %766 = vmatprep.subr.bf16.mxu1 %v806_v9 }
  0x2a   : > { %750 = vmatpush3.bf16.msra.mxu0 %v806_v9  ;;  %774 = vmatpush3.bf16.msra.mxu1 %v806_v9 }
  0x2d   : > { %752 = vmatmul.mubr.bf16.vlgmr.msra.gmra.mxu0 %v809_v10  ;;  %756 = vmatmul.mubr.bf16.vlgmr.msra.gmra.mxu1 %v810_v11 }
  0xed   : > { %v753_v13 = vpop.f32.mrf.mxu0  ;;  %v757_v14 = vpop.f32.mrf.mxu1 }
  0xee   : > { %v477_v15 = vadd.f32 %v753_v13, %v681_v12  ;;  %v481_v16 = vadd.f32 %v757_v14, %v681_v12 }
  0xef   : > { %v410_v17 = vpop.f32.mrf.mxu0  ;;  %v426_v18 = vpop.f32.mrf.mxu1 }
  0xf0   : > { %vm485_vm0 = vcmp.ge.f32.partialorder %v477_v15, 0.0  ;;  %v493_v19 = vmul.f32 0.2, %v477_v15  ;;  %vm489_vm1 = vcmp.ge.f32.partialorder %v481_v16, 0.0  ;;  %v497_v20 = vmul.f32 0.2, %v481_v16 }
  0xf1   : > { %v475_v21 = vadd.f32 %v681_v12, %v410_v17  ;;  %v754_v22 = vpop.f32.mrf.mxu0  ;;  %v758_v23 = vpop.f32.mrf.mxu1  ;;  %v479_v24 = vadd.f32 %v681_v12, %v426_v18 }
  0xf2   : > { %v478_v25 = vadd.f32 %v754_v22, %v681_v12  ;;  %v482_v26 = vadd.f32 %v758_v23, %v681_v12  ;;  %v501_v27 = vsel %vm485_vm0, %v477_v15, %v493_v19  ;;  %v505_v28 = vsel %vm489_vm1, %v481_v16, %v497_v20 }
  0xf3   : > { %v413_v29 = vpop.f32.mrf.mxu0  ;;  %v429_v30 = vpop.f32.mrf.mxu1  ;;  %vm483_vm4 = vcmp.ge.f32.partialorder %v475_v21, 0.0  ;;  %v491_v33 = vmul.f32 0.2, %v475_v21  ;;  %vm487_vm5 = vcmp.ge.f32.partialorder %v479_v24, 0.0  ;;  %v495_v36 = vmul.f32 0.2, %v479_v24 }
  0xf4   : > { %vm486_vm2 = vcmp.ge.f32.partialorder %v478_v25, 0.0  ;;  %v494_v31 = vmul.f32 0.2, %v478_v25  ;;  %vm490_vm3 = vcmp.ge.f32.partialorder %v482_v26, 0.0  ;;  %v498_v32 = vmul.f32 0.2, %v482_v26 }
  0xf5   : > { %v476_v34 = vadd.f32 %v681_v12, %v413_v29  ;;  %v480_v35 = vadd.f32 %v681_v12, %v429_v30  ;;  %v499_v43 = vsel %vm483_vm4, %v475_v21, %v491_v33  ;;  %v503_v45 = vsel %vm487_vm5, %v479_v24, %v495_v36 }
  0xf6   : > { %v502_v37 = vsel %vm486_vm2, %v478_v25, %v494_v31  ;;  %v506_v38 = vsel %vm490_vm3, %v482_v26, %v498_v32 }
  0xf7   : > { %v708_v39 = vpack.c.bf16 %v502_v37, %v501_v27  ;;  %v718_v40 = vpack.c.bf16 %v506_v38, %v505_v28  ;;  %vm484_vm6 = vcmp.ge.f32.partialorder %v476_v34, 0.0  ;;  %v492_v41 = vmul.f32 0.2, %v476_v34 }
  0xf8   : > { %vm488_vm7 = vcmp.ge.f32.partialorder %v480_v35, 0.0  ;;  %v496_v42 = vmul.f32 0.2, %v480_v35 }
  0xf9   : > { %720 = vst [vmem:[%s257_s17 + $0x8] sm:$0xff] %v708_v39   ;;  %722 = vst [vmem:[%s257_s17 + $0x18] sm:$0xff] %v718_v40   ;;  %v500_v44 = vsel %vm484_vm6, %v476_v34, %v492_v41 }
  0xfa   : > { %v703_v46 = vpack.c.bf16 %v500_v44, %v499_v43  ;;  %v504_v47 = vsel %vm488_vm7, %v480_v35, %v496_v42 }
  0xfb   : > { %v713_v48 = vpack.c.bf16 %v504_v47, %v503_v45 }
  0xfc   : > { %704 = vst [vmem:[%s257_s17] sm:$0xff] %v703_v46  }
  0xfd   : > { %721 = vst [vmem:[%s257_s17 + $0x10] sm:$0xff] %v713_v48  }
  0xfe PF: > { %s13_s14 = sadd.s32 1, %s833_s14   ;;  %s932_s12 = smov %s829_s13 }
  0xff   : > { %p10_p5 = scmp.ge.s32.totalorder %s13_s14, 4   ;;  %s933_s13 = smov %s935_s15 }
 0x101   :  { %12 = sbr.rel (!%p10_p5) target bundleno = 2 (0x2), region = 76 }

// kernel: discriminator_forward.7
= control target key start
LH: loop header
LB: loop body
LE: loop exit
PB: predicated region body
PF: predicated region fallthrough
CT: control target
= control target key end

     0   :  { %s757_s12 = smov 0   ;;  %s759_s13 = smov 0   ;;  %s845_s0 = inlined_call_operand.vmem [shape: bf16[32,256], index: 0, kind: input, shape index: {}]   ;;  %s846_s1 = inlined_call_operand.vmem [shape: bf16[256,128], index: 1, kind: input, shape index: {}]   ;;  %s847_s2 = inlined_call_operand.vmem [shape: f32[1,128], index: 2, kind: input, shape index: {}]   ;;  %s848_s3 = inlined_call_operand.vmem [shape: bf16[32,128], index: 3, kind: output, shape index: {}]  }
   0x1   :  { %s761_s14 = smov 0  }
   0x2 LB: > { %s32_s15 = sadd.s32 1, %s731_s13  ;;  %p611_p0 = scmp.ge.s32.totalorder %s735_s14, 1  ;;  %s735_s14 = sphi %s761_s14, %s13_s14   ;;  %s731_s13 = sphi %s759_s13, %s850_s13   ;;  %s727_s12 = sphi %s757_s12, %s849_s12  }
   0x3   : > { %p34_p1 = scmp.ge.s32.totalorder %s32_s15, 2  ;;  %p191_p2 = scmp.lt.s32.totalorder %s735_s14, 3 }
   0x5   : > { %s852_s15 = smov (%p34_p1, %s32_s15), 0  ;;  %p192_p3 = pnand %p611_p0, %p191_p2 }
   0x6   : > { %s612_s18 = sshll.u32 (!%p192_p3), %s727_s12, 1 }
   0x7   : > { %195 = sbr.rel (%p192_p3) target bundleno = 254 (0xfe), region = 32  ;;  %p236_p4 = scmp.lt.s32.totalorder (!%p192_p3), %s612_s18, 3 }
   0xc   : > { %v694_v0 = vld [vmem:[%s846_s1 + $0x78] sm:$0xff]   ;;  %v696_v2 = vld [vmem:[%s846_s1 + $0x70] sm:$0xff]   ;;  %v698_v4 = vld [vmem:[%s846_s1 + $0x68] sm:$0xff]   ;;  %s854_s18 = smov (!%p236_p4, %s612_s18), 3 }
   0xd   : > { %v695_v1 = vld [vmem:[%s846_s1 + $0x38] sm:$0xff]   ;;  %648 = vmatprep.subr.bf16.mxu0 %v694_v0  ;;  %v697_v3 = vld [vmem:[%s846_s1 + $0x30] sm:$0xff]   ;;  %v699_v5 = vld [vmem:[%s846_s1 + $0x28] sm:$0xff]   ;;  %s640_s6 = sshll.u32 %s854_s18, 3  ;;  %s616_s5 = sshll.u32 %s854_s18, 2 }
   0xe   : > { %649 = vmatpush3.bf16.msra.mxu0 %v695_v1  ;;  %v700_v6 = vld [vmem:[%s846_s1 + $0x60] sm:$0xff]   ;;  %v702_v8 = vld [vmem:[%s846_s1 + $0x58] sm:$0xff]   ;;  %s243_s11 = scalar_lea.vmem %s845_s0, %s640_s6  ;;  %v704_v10 = vld [vmem:[%s846_s1 + $0x50] sm:$0xff]   ;;  %s265_s8 = scalar_lea.vmem %s848_s3, %s616_s5 }
   0xf   : > { %650 = vmatprep.subr.bf16.mxu0 %v696_v2  ;;  %v701_v7 = vld [vmem:[%s846_s1 + $0x20] sm:$0xff]   ;;  %v703_v9 = vld [vmem:[%s846_s1 + $0x18] sm:$0xff]   ;;  %v705_v12 = vld [vmem:[%s846_s1 + $0x10] sm:$0xff]  }
  0x10   : > { %v712_v11 = vld [vmem:[%s243_s11 + $0x4] ss:$8 sps:$4 sm:$0xff]   ;;  %v710_v17 = vld [vmem:[%s243_s11] ss:$8 sps:$4 sm:$0xff]  }
  0x11   : > { %448 = vmatprep.mubr.bf16.mxu0 %v712_v11  ;;  %v706_v13 = vld [vmem:[%s846_s1 + $0x48] sm:$0xff]   ;;  %v708_v15 = vld [vmem:[%s846_s1 + $0x40] sm:$0xff]  }
  0x12   : > { %651 = vmatpush3.bf16.msra.mxu0 %v697_v3  ;;  %v707_v14 = vld [vmem:[%s846_s1 + $0x8] sm:$0xff]   ;;  %v709_v16 = vld [vmem:[%s846_s1] sm:$0xff]  }
  0x13   : > { %652 = vmatprep.subr.bf16.mxu0 %v698_v4  ;;  %v635_v20 = vld [vmem:[%s847_s2] ss:$0 sm:$0xff] }
  0x16   : > { %653 = vmatpush3.bf16.msra.mxu0 %v699_v5 }
  0x17   : > { %654 = vmatprep.subr.bf16.mxu0 %v700_v6 }
  0x1a   : > { %655 = vmatpush3.bf16.msra.mxu0 %v701_v7 }
  0x1b   : > { %656 = vmatprep.subr.bf16.mxu0 %v702_v8 }
  0x1e   : > { %657 = vmatpush3.bf16.msra.mxu0 %v703_v9 }
  0x1f   : > { %658 = vmatprep.subr.bf16.mxu0 %v704_v10 }
  0x22   : > { %659 = vmatpush3.bf16.msra.mxu0 %v705_v12 }
  0x23   : > { %660 = vmatprep.subr.bf16.mxu0 %v706_v13 }
  0x26   : > { %661 = vmatpush3.bf16.msra.mxu0 %v707_v14 }
  0x27   : > { %662 = vmatprep.subr.bf16.mxu0 %v708_v15 }
  0x2a   : > { %663 = vmatpush3.bf16.msra.mxu0 %v709_v16 }
  0x2d   : > { %449 = vmatmul.mubr.bf16.vlgmr.msra.gmra.mxu0 %v710_v17 }
  0xed   : > { %v664_v18 = vpop.f32.mrf.mxu0 }
  0xef   : > { %v665_v19 = vpop.f32.mrf.mxu0 }
  0xf0   : > { %v666_v21 = vadd.f32 %v665_v19, %v664_v18 }
  0xf1   : > { %v667_v22 = vpop.f32.mrf.mxu0 }
  0xf2   : > { %v473_v23 = vadd.f32 %v666_v21, %v635_v20 }
  0xf3   : > { %v668_v24 = vpop.f32.mrf.mxu0 }
  0xf4   : > { %v669_v25 = vadd.f32 %v668_v24, %v667_v22  ;;  %v477_v26 = vmul.f32 0.2, %v473_v23  ;;  %vm475_vm0 = vcmp.ge.f32.partialorder %v473_v23, 0.0 }
  0xf6   : > { %v474_v27 = vadd.f32 %v669_v25, %v635_v20  ;;  %v479_v29 = vsel %vm475_vm0, %v473_v23, %v477_v26 }
  0xf8   : > { %vm476_vm1 = vcmp.ge.f32.partialorder %v474_v27, 0.0  ;;  %v478_v28 = vmul.f32 0.2, %v474_v27 }
  0xfa   : > { %v480_v30 = vsel %vm476_vm1, %v474_v27, %v478_v28 }
  0xfb   : > { %v646_v31 = vpack.c.bf16 %v480_v30, %v479_v29 }
  0xfd   : > { %647 = vst [vmem:[%s265_s8] sm:$0xff] %v646_v31  }
  0xfe PF: > { %s13_s14 = sadd.s32 1, %s735_s14   ;;  %s849_s12 = smov %s731_s13 }
  0xff   : > { %p10_p5 = scmp.ge.s32.totalorder %s13_s14, 4   ;;  %s850_s13 = smov %s852_s15 }
 0x101   :  { %12 = sbr.rel (!%p10_p5) target bundleno = 2 (0x2), region = 76 }

// kernel: discriminator_forward.8
= control target key start
LH: loop header
LB: loop body
LE: loop exit
PB: predicated region body
PF: predicated region fallthrough
CT: control target
= control target key end

     0   :  { %s1347_s12 = smov 0   ;;  %s1349_s13 = smov 0   ;;  %s1547_s0 = inlined_call_operand.vmem [shape: bf16[18,512], index: 0, kind: input, shape index: {}]   ;;  %s1548_s1 = inlined_call_operand.vmem [shape: bf16[512,128], index: 1, kind: input, shape index: {}]   ;;  %s1549_s2 = inlined_call_operand.vmem [shape: f32[1,128], index: 2, kind: input, shape index: {}]   ;;  %s1550_s3 = inlined_call_operand.vmem [shape: bf16[18,128], index: 3, kind: output, shape index: {}]  }
   0x1   :  { %s1351_s14 = smov 0   ;;  %s1353_s15 = smov 0  }
   0x2   :  { %s1355_s16 = smov 0  }
   0x3 LB: > { %s959_s17 = sadd.s32 4294967295, %s1293_s16   ;;  %s32_s18 = sadd.s32 1, %s1289_s15  ;;  %s1293_s16 = sphi %s1355_s16, %s13_s16   ;;  %s1289_s15 = sphi %s1353_s15, %s1555_s15   ;;  %s1285_s14 = sphi %s1351_s14, %s1554_s14   ;;  %s1281_s13 = sphi %s1349_s13, %s1553_s13   ;;  %s1277_s12 = sphi %s1347_s12, %s1552_s12  }
   0x4   : > { %p34_p0 = scmp.ge.s32.totalorder %s32_s18, 2  ;;  %s123_s19 = sadd.s32 1, %s1281_s13 }
   0x5   : > { %p133_p1 = scmp.ne.s32.totalorder %s1281_s13, %s1277_s12  ;;  %p134_p2 = scmp.eq.s32.totalorder %s959_s17, 1 }
   0x6   : > { %s1557_s18 = smov (%p34_p0, %s32_s18), 0  ;;  %p965_p4 = scmp.ge.s32.totalorder %s1293_s16, 1 }
   0x7   : > { %p1379_p3 = por %p134_p2, %p133_p1  ;;  %s118_s21 = ssub.s32 %s1289_s15, %s1557_s18 }
   0x8   : > { %p201_p5 = scmp.lt.s32.totalorder %s1293_s16, 3  ;;  %p121_p6 = scmp.eq.s32.totalorder %s118_s21, 0 }
   0xa   : > { %p202_p7 = pnand %p965_p4, %p201_p5 }
   0xb   : > { %s1388_s22 = scalar_select %p121_p6, %s1281_s13, %s123_s19  }
   0xc   : > { %205 = sbr.rel (%p202_p7) target bundleno = 302 (0x12e), region = 32  ;;  %s1439_s9 = sshll.u32 (!%p202_p7), %s1285_s14, 1 }
   0xd   : > { %p252_p8 = scmp.lt.s32.totalorder (!%p202_p7), %s1439_s9, 2  ;;  %s242_s19 = sand.u32 (!%p202_p7), 1, %s1277_s12  }
   0xe   : > { %s966_s21 = sshll.u32 (!%p202_p7), %s242_s19, 3 }
  0x11   : > { %v1185_v0 = vld [vmem:[%s1548_s1 + $0x78] sm:$0xff]   ;;  %v1189_v4 = vld [vmem:[%s1548_s1 + $0x70] sm:$0xff]   ;;  %v1193_v8 = vld [vmem:[%s1548_s1 + $0x68] sm:$0xff]   ;;  %s253_s5 = scalar_select %p252_p8, %s1439_s9, 2 }
  0x12   : > { %v1186_v1 = vld [vmem:[%s1548_s1 + $0xf8] sm:$0xff]   ;;  %1037 = vmatprep.subr.bf16.mxu0 %v1185_v0  ;;  %v1190_v5 = vld [vmem:[%s1548_s1 + $0xf0] sm:$0xff]   ;;  %v1194_v9 = vld [vmem:[%s1548_s1 + $0xe8] sm:$0xff]   ;;  %s697_s12 = ssub.s32 (%p1379_p3), 3, %s1439_s9  ;;  %s1029_s24 = sshll.u32 (%p1379_p3), %s1285_s14, 3 }
  0x13   : > { %v1187_v2 = vld [vmem:[%s1548_s1 + $0x38] sm:$0xff]   ;;  %1059 = vmatprep.subr.bf16.mxu1 %v1186_v1  ;;  %v1191_v6 = vld [vmem:[%s1548_s1 + $0x30] sm:$0xff]   ;;  %v1195_v10 = vld [vmem:[%s1548_s1 + $0x28] sm:$0xff]   ;;  %s1026_s23 = sshll.u32 %s253_s5, 4  ;;  %p698_p9 = scmp.lt.s32.totalorder (%p1379_p3), %s697_s12, 2 }
  0x14   : > { %v1188_v3 = vld [vmem:[%s1548_s1 + $0xb8] sm:$0xff]   ;;  %1038 = vmatpush3.bf16.msra.mxu0 %v1187_v2  ;;  %v1192_v7 = vld [vmem:[%s1548_s1 + $0xb0] sm:$0xff]   ;;  %v1196_v11 = vld [vmem:[%s1548_s1 + $0xa8] sm:$0xff]   ;;  %s259_s6 = scalar_lea.vmem %s1547_s0, %s1026_s23  ;;  %s1498_s23 = scalar_lea.vmem [#allocation3], %s966_s21  }
  0x15   : > { %1060 = vmatpush3.bf16.msra.mxu1 %v1188_v3  ;;  %1039 = vmatprep.subr.bf16.mxu0 %v1189_v4  ;;  %v1197_v12 = vld [vmem:[%s1548_s1 + $0x60] sm:$0xff]   ;;  %v1201_v16 = vld [vmem:[%s1548_s1 + $0x58] sm:$0xff]   ;;  %v1205_v20 = vld [vmem:[%s1548_s1 + $0x50] sm:$0xff]   ;;  %s1508_s27 = scalar_lea.vmem (%p1379_p3), %s1550_s3, %s1029_s24  }
  0x16   : > { %1061 = vmatprep.subr.bf16.mxu1 %v1190_v5  ;;  %v1198_v13 = vld [vmem:[%s1548_s1 + $0xe0] sm:$0xff]   ;;  %v1202_v17 = vld [vmem:[%s1548_s1 + $0xd8] sm:$0xff]   ;;  %v1206_v21 = vld [vmem:[%s1548_s1 + $0xd0] sm:$0xff]  }
  0x17   : > { %v1199_v14 = vld [vmem:[%s1548_s1 + $0x20] sm:$0xff]   ;;  %v1203_v18 = vld [vmem:[%s1548_s1 + $0x18] sm:$0xff]   ;;  %v1207_v22 = vld [vmem:[%s1548_s1 + $0x10] sm:$0xff]  }
  0x18   : > { %1040 = vmatpush3.bf16.msra.mxu0 %v1191_v6  ;;  %v1200_v15 = vld [vmem:[%s1548_s1 + $0xa0] sm:$0xff]   ;;  %v1204_v19 = vld [vmem:[%s1548_s1 + $0x98] sm:$0xff]   ;;  %v1208_v23 = vld [vmem:[%s1548_s1 + $0x90] sm:$0xff]  }
  0x19   : > { %1062 = vmatpush3.bf16.msra.mxu1 %v1192_v7  ;;  %1041 = vmatprep.subr.bf16.mxu0 %v1193_v8  ;;  %v1209_v24 = vld [vmem:[%s1548_s1 + $0x48] sm:$0xff]   ;;  %v1213_v28 = vld [vmem:[%s1548_s1 + $0x40] sm:$0xff]  }
  0x1a   : > { %1063 = vmatprep.subr.bf16.mxu1 %v1194_v9  ;;  %v1210_v25 = vld [vmem:[%s1548_s1 + $0xc8] sm:$0xff]   ;;  %v1214_v29 = vld [vmem:[%s1548_s1 + $0xc0] sm:$0xff]  }
  0x1b   : > { %v1211_v26 = vld [vmem:[%s1548_s1 + $0x8] sm:$0xff]   ;;  %v1215_v30 = vld [vmem:[%s1548_s1] sm:$0xff]  }
  0x1c   : > { %1042 = vmatpush3.bf16.msra.mxu0 %v1195_v10  ;;  %v1212_v27 = vld [vmem:[%s1548_s1 + $0x88] sm:$0xff]   ;;  %v1216_v31 = vld [vmem:[%s1548_s1 + $0x80] sm:$0xff]  }
  0x1d   : > { %1064 = vmatpush3.bf16.msra.mxu1 %v1196_v11  ;;  %1043 = vmatprep.subr.bf16.mxu0 %v1197_v12  ;;  %v1217_v32 = vld [vmem:[%s259_s6] ss:$16 sps:$4 sm:$0xff]   ;;  %v1219_v33 = vld [vmem:[%s259_s6 + $0x4] ss:$16 sps:$4 sm:$0xff]   ;;  %v1220_v34 = vld [vmem:[%s259_s6 + $0x8] ss:$16 sps:$4 sm:$0xff]  }
  0x1e   : > { %1065 = vmatprep.subr.bf16.mxu1 %v1198_v13  ;;  %v1222_v35 = vld [vmem:[%s259_s6 + $0xc] ss:$16 sps:$4 sm:$0xff]   ;;  %605 = vmatprep.mubr.bf16.mxu0 %v1219_v33  ;;  %v1006_v43 = vld [vmem:[%s1549_s2] ss:$0 sm:$0xff] }
  0x1f   : > { %646 = vmatprep.mubr.bf16.mxu1 %v1222_v35 }
  0x20   : > { %1044 = vmatpush3.bf16.msra.mxu0 %v1199_v14 }
  0x21   : > { %1066 = vmatpush3.bf16.msra.mxu1 %v1200_v15  ;;  %1045 = vmatprep.subr.bf16.mxu0 %v1201_v16 }
  0x22   : > { %1067 = vmatprep.subr.bf16.mxu1 %v1202_v17 }
  0x24   : > { %1046 = vmatpush3.bf16.msra.mxu0 %v1203_v18 }
  0x25   : > { %1068 = vmatpush3.bf16.msra.mxu1 %v1204_v19  ;;  %1047 = vmatprep.subr.bf16.mxu0 %v1205_v20 }
  0x26   : > { %1069 = vmatprep.subr.bf16.mxu1 %v1206_v21 }
  0x28   : > { %1048 = vmatpush3.bf16.msra.mxu0 %v1207_v22 }
  0x29   : > { %1070 = vmatpush3.bf16.msra.mxu1 %v1208_v23  ;;  %1049 = vmatprep.subr.bf16.mxu0 %v1209_v24 }
  0x2a   : > { %1071 = vmatprep.subr.bf16.mxu1 %v1210_v25 }
  0x2c   : > { %1050 = vmatpush3.bf16.msra.mxu0 %v1211_v26 }
  0x2d   : > { %1072 = vmatpush3.bf16.msra.mxu1 %v1212_v27  ;;  %1051 = vmatprep.subr.bf16.mxu0 %v1213_v28 }
  0x2e   : > { %1073 = vmatprep.subr.bf16.mxu1 %v1214_v29 }
  0x30   : > { %1052 = vmatpush3.bf16.msra.mxu0 %v1215_v30 }
  0x31   : > { %1074 = vmatpush3.bf16.msra.mxu1 %v1216_v31 }
  0x33   : > { %606 = vmatmul.mubr.bf16.vlgmr.msra.gmra.mxu0 %v1217_v32 }
  0x34   : > { %647 = vmatmul.mubr.bf16.vlgmr.msra.gmra.mxu1 %v1220_v34 }
  0xf3   : > { %v1053_v36 = vpop.f32.mrf.mxu0 }
  0xf4   : > { %v1075_v37 = vpop.f32.mrf.mxu1 }
  0xf5   : > { %v1054_v38 = vpop.f32.mrf.mxu0 }
  0xf6   : > { %v1055_v39 = vadd.f32 %v1054_v38, %v1053_v36  ;;  %v1076_v40 = vpop.f32.mrf.mxu1 }
  0xf7   : > { %v1077_v41 = vadd.f32 %v1076_v40, %v1075_v37  ;;  %v1056_v42 = vpop.f32.mrf.mxu0 }
  0xf8   : > { %v1078_v44 = vpop.f32.mrf.mxu1 }
  0xf9   : > { %v649_v45 = vadd.f32 %v1077_v41, %v1055_v39  ;;  %v1057_v46 = vpop.f32.mrf.mxu0 }
  0xfa   : > { %v1058_v47 = vadd.f32 %v1057_v46, %v1056_v42  ;;  %v1079_v48 = vpop.f32.mrf.mxu1 }
  0xfb   : > { %v671_v49 = vadd.f32 %v1006_v43, %v649_v45  ;;  %v1080_v50 = vadd.f32 %v1079_v48, %v1078_v44 }
  0xfd   : > { %v652_v51 = vadd.f32 %v1080_v50, %v1058_v47  ;;  %v675_v52 = vmul.f32 0.2, %v671_v49  ;;  %vm673_vm0 = vcmp.ge.f32.partialorder %v671_v49, 0.0 }
  0xff   : > { %v672_v53 = vadd.f32 %v1006_v43, %v652_v51  ;;  %v677_v55 = vsel %vm673_vm0, %v671_v49, %v675_v52 }
 0x101   : > { %vm674_vm1 = vcmp.ge.f32.partialorder %v672_v53, 0.0  ;;  %v676_v54 = vmul.f32 0.2, %v672_v53 }
 0x102   : > { %695 = sbr.rel (!%p1379_p3) target bundleno = 302 (0x12e), region = 44 }
 0x103   : > { %v678_v56 = vsel %vm674_vm1, %v672_v53, %v676_v54 }
 0x104   : > { %v1035_v57 = vpack.c.bf16 %v678_v56, %v677_v55 }
 0x106   : > { %1036 = vst [vmem:[%s1498_s23] sm:$0xff] %v1035_v57  }
 0x107   : > { %s1559_s12 = smov (!%p698_p9, %s697_s12), 2 }
 0x108   : > { %s1011_s28 = sshll.u32 %s1559_s12, 6 }
 0x109   : > { %p1014_p10 = scmp.eq.s32.totalorder %s1011_s28, 0 }
 0x10a   : > { %s1514_s29 = sshrl.u32 (!%p1014_p10), %s1559_s12, 1 }
 0x10b   : > { %707 = sbr.rel (%p1014_p10) target bundleno = 302 (0x12e), region = 48  ;;  %p1015_p11 = scmp.le.s32.totalorder (!%p1014_p10), %s1514_s29, 0 }
 0x110   : > { %886 = sbr.rel (%p1015_p11) target bundleno = 285 (0x11d), region = 126  ;;  %s1295_s14 = smov (!%p1015_p11), %s1508_s27  }
 0x111   : > { %s1299_s20 = smov (!%p1015_p11), %s1498_s23   ;;  %s1303_s9 = smov (!%p1015_p11), 0  }
 0x112   : > { %s1307_s30 = smov (!%p1015_p11), 0  }
 0x115 LB: >> { %v724_v58 = vld [vmem:[%s1301_s20] sm:$0xf]  ;;  %v726_v59 = vld [vmem:[%s1301_s20 + $0x4] sm:$0xf]  ;;  %s728_s4 = sadd.s32 1, %s1305_s9  ;;  %s718_s30 = sadd.s32 1, %s1309_s30   ;;  %s1309_s30 = sphi %s1307_s30, %s718_s30   ;;  %s1305_s9 = sphi %s1303_s9, %s1304_s9   ;;  %s1301_s20 = sphi %s1299_s20, %s733_s20   ;;  %s1297_s14 = sphi %s1295_s14, %s734_s14  }
 0x116   : >> { %725 = vst [vmem:[%s1297_s14] sm:$0xf] %v724_v58  ;;  %727 = vst [vmem:[%s1297_s14 + $0x4] sm:$0xf] %v726_v59  ;;  %p729_p12 = scmp.ge.s32.totalorder %s728_s4, %s1514_s29  ;;  %p717_p13 = scmp.ge.s32.totalorder %s718_s30, %s1514_s29 }
 0x118   : >> { %s1561_s4 = smov (%p729_p12, %s728_s4), 0  ;;  %720 = sbr.rel (!%p717_p13) target bundleno = 277 (0x115), region = 132 }
 0x119   : >> { %s1016_s6 = sshll.u32 %s1561_s4, 3  ;;  %s1304_s9 = smov %s1561_s4  }
 0x11a   : >> { %s733_s20 = scalar_lea.vmem %s1498_s23, %s1016_s6 [#allocation3]   ;;  %s734_s14 = scalar_lea.vmem %s1508_s27, %s1016_s6  }
 0x11d PF: > { %s1524_s5 = sand.u32 1, %s1559_s12   ;;  %s1030_s7 = sshll.u32 %s1514_s29, 3 }
 0x11e   : > { %s739_s8 = scalar_lea.vmem %s1498_s23, %s1030_s7 [#allocation3]   ;;  %s741_s10 = scalar_lea.vmem %s1508_s27, %s1030_s7  }
 0x11f   : > { %p1021_p0 = scmp.le.s32.totalorder %s1524_s5, 0 }
 0x120   : > { %s1311_s11 = smov (!%p1021_p0), %s741_s10   ;;  %s1315_s17 = smov (!%p1021_p0), %s739_s8  }
 0x121   : > { %900 = sbr.rel (%p1021_p0) target bundleno = 302 (0x12e), region = 137  ;;  %s1319_s19 = smov (!%p1021_p0), 0  }
 0x122   : > { %s1323_s21 = smov (!%p1021_p0), 0  }
 0x126 LB: >> { %v751_v60 = vld [vmem:[%s1317_s17] sm:$0xf]  ;;  %s753_s12 = sadd.s32 1, %s1321_s19  ;;  %s745_s21 = sadd.s32 1, %s1325_s21   ;;  %s1325_s21 = sphi %s1323_s21, %s745_s21   ;;  %s1321_s19 = sphi %s1319_s19, %s1320_s19   ;;  %s1317_s17 = sphi %s1315_s17, %s758_s17   ;;  %s1313_s11 = sphi %s1311_s11, %s759_s11  }
 0x127   : >> { %752 = vst [vmem:[%s1313_s11] sm:$0xf] %v751_v60  ;;  %p754_p1 = scmp.ge.s32.totalorder %s753_s12, %s1524_s5  ;;  %p744_p2 = scmp.ge.s32.totalorder %s745_s21, %s1524_s5 }
 0x129   : >> { %s1563_s12 = smov (%p754_p1, %s753_s12), 0  ;;  %747 = sbr.rel (!%p744_p2) target bundleno = 294 (0x126), region = 143 }
 0x12a   : >> { %s1022_s23 = sshll.u32 %s1563_s12, 2  ;;  %s1320_s19 = smov %s1563_s12  }
 0x12b   : >> { %s758_s17 = scalar_lea.vmem %s739_s8, %s1022_s23 [#allocation3]   ;;  %s759_s11 = scalar_lea.vmem %s741_s10, %s1022_s23  }
 0x12e PF: > { %s13_s16 = sadd.s32 1, %s1293_s16   ;;  %s1552_s12 = smov %s1281_s13 }
 0x12f   : > { %p10_p3 = scmp.ge.s32.totalorder %s13_s16, 4   ;;  %s1553_s13 = smov %s1388_s22 }
 0x130   : > { %s1554_s14 = smov %s1289_s15  ;;  %s1555_s15 = smov %s1557_s18 }
 0x131   :  { %12 = sbr.rel (!%p10_p3) target bundleno = 3 (0x3), region = 154 }

// kernel: discriminator_forward.9
= control target key start
LH: loop header
LB: loop body
LE: loop exit
PB: predicated region body
PF: predicated region fallthrough
CT: control target
= control target key end

     0   :  { %s1269_s1 = inlined_call_operand.vmem [shape: bf16[1024,128], index: 1, kind: input, shape index: {}]   ;;  %s1270_s0 = inlined_call_operand.vmem [shape: bf16[16,1024], index: 0, kind: input, shape index: {}]   ;;  %s1271_s2 = inlined_call_operand.vmem [shape: f32[1,128], index: 2, kind: input, shape index: {}]   ;;  %s1272_s3 = inlined_call_operand.vmem [shape: f32[16,128], index: 3, kind: output, shape index: {}]  }
   0x1   :  { %v952_v0 = vld [vmem:[%s1269_s1 + $0x78] sm:$0xff]   ;;  %v956_v4 = vld [vmem:[%s1269_s1 + $0x70] sm:$0xff]   ;;  %v960_v8 = vld [vmem:[%s1269_s1 + $0x68] sm:$0xff]  }
   0x2   :  { %v953_v1 = vld [vmem:[%s1269_s1 + $0xf8] sm:$0xff]   ;;  %864 = vmatprep.subr.bf16.mxu0 %v952_v0  ;;  %v957_v5 = vld [vmem:[%s1269_s1 + $0xf0] sm:$0xff]   ;;  %v961_v9 = vld [vmem:[%s1269_s1 + $0xe8] sm:$0xff]  }
   0x3   :  { %v954_v2 = vld [vmem:[%s1269_s1 + $0x38] sm:$0xff]   ;;  %886 = vmatprep.subr.bf16.mxu1 %v953_v1  ;;  %v958_v6 = vld [vmem:[%s1269_s1 + $0x30] sm:$0xff]   ;;  %v962_v10 = vld [vmem:[%s1269_s1 + $0x28] sm:$0xff]  }
   0x4   :  { %v955_v3 = vld [vmem:[%s1269_s1 + $0xb8] sm:$0xff]   ;;  %865 = vmatpush3.bf16.msra.mxu0 %v954_v2  ;;  %v959_v7 = vld [vmem:[%s1269_s1 + $0xb0] sm:$0xff]   ;;  %v963_v11 = vld [vmem:[%s1269_s1 + $0xa8] sm:$0xff]  }
   0x5   :  { %887 = vmatpush3.bf16.msra.mxu1 %v955_v3  ;;  %866 = vmatprep.subr.bf16.mxu0 %v956_v4  ;;  %v964_v12 = vld [vmem:[%s1269_s1 + $0x60] sm:$0xff]   ;;  %v968_v16 = vld [vmem:[%s1269_s1 + $0x58] sm:$0xff]   ;;  %v972_v20 = vld [vmem:[%s1269_s1 + $0x50] sm:$0xff]  }
   0x6   :  { %888 = vmatprep.subr.bf16.mxu1 %v957_v5  ;;  %v965_v13 = vld [vmem:[%s1269_s1 + $0xe0] sm:$0xff]   ;;  %v969_v17 = vld [vmem:[%s1269_s1 + $0xd8] sm:$0xff]   ;;  %v973_v21 = vld [vmem:[%s1269_s1 + $0xd0] sm:$0xff]  }
   0x7   :  { %v966_v14 = vld [vmem:[%s1269_s1 + $0x20] sm:$0xff]   ;;  %v970_v18 = vld [vmem:[%s1269_s1 + $0x18] sm:$0xff]   ;;  %v974_v22 = vld [vmem:[%s1269_s1 + $0x10] sm:$0xff]  }
   0x8   :  { %867 = vmatpush3.bf16.msra.mxu0 %v958_v6  ;;  %v967_v15 = vld [vmem:[%s1269_s1 + $0xa0] sm:$0xff]   ;;  %v971_v19 = vld [vmem:[%s1269_s1 + $0x98] sm:$0xff]   ;;  %v975_v23 = vld [vmem:[%s1269_s1 + $0x90] sm:$0xff]  }
   0x9   :  { %889 = vmatpush3.bf16.msra.mxu1 %v959_v7  ;;  %868 = vmatprep.subr.bf16.mxu0 %v960_v8  ;;  %v976_v24 = vld [vmem:[%s1269_s1 + $0x48] sm:$0xff]   ;;  %v980_v28 = vld [vmem:[%s1269_s1 + $0x40] sm:$0xff]   ;;  %v984_v40 = vld [vmem:[%s1269_s1 + $0x178] sm:$0xff]  }
   0xa   :  { %890 = vmatprep.subr.bf16.mxu1 %v961_v9  ;;  %v977_v25 = vld [vmem:[%s1269_s1 + $0xc8] sm:$0xff]   ;;  %v981_v29 = vld [vmem:[%s1269_s1 + $0xc0] sm:$0xff]   ;;  %v985_v41 = vld [vmem:[%s1269_s1 + $0x1f8] sm:$0xff]  }
   0xb   :  { %v978_v26 = vld [vmem:[%s1269_s1 + $0x8] sm:$0xff]   ;;  %v982_v30 = vld [vmem:[%s1269_s1] sm:$0xff]   ;;  %v986_v42 = vld [vmem:[%s1269_s1 + $0x138] sm:$0xff]  }
   0xc   :  { %869 = vmatpush3.bf16.msra.mxu0 %v962_v10  ;;  %v979_v27 = vld [vmem:[%s1269_s1 + $0x88] sm:$0xff]   ;;  %v983_v31 = vld [vmem:[%s1269_s1 + $0x80] sm:$0xff]   ;;  %v987_v43 = vld [vmem:[%s1269_s1 + $0x1b8] sm:$0xff]  }
   0xd   :  { %891 = vmatpush3.bf16.msra.mxu1 %v963_v11  ;;  %870 = vmatprep.subr.bf16.mxu0 %v964_v12  ;;  %v23_v32 = vld [vmem:[%s1270_s0] sm:$0xff]  ;;  %v24_v34 = vld [vmem:[%s1270_s0 + $0x8] sm:$0xff]  ;;  %v988_v44 = vld [vmem:[%s1269_s1 + $0x170] sm:$0xff]  }
   0xe   :  { %892 = vmatprep.subr.bf16.mxu1 %v965_v13  ;;  %v27_v33 = vld [vmem:[%s1270_s0 + $0x20] sm:$0xff]  ;;  %v28_v37 = vld [vmem:[%s1270_s0 + $0x28] sm:$0xff]  ;;  %v989_v45 = vld [vmem:[%s1269_s1 + $0x1f0] sm:$0xff]  }
   0xf   :  { %v791_v35 = vcombine.low %v23_v32, %v27_v33  ;;  %v792_v36 = vcombine.high %v23_v32, %v27_v33  ;;  %v793_v38 = vcombine.low %v24_v34, %v28_v37  ;;  %v794_v39 = vcombine.high %v24_v34, %v28_v37  ;;  %v990_v46 = vld [vmem:[%s1269_s1 + $0x130] sm:$0xff]   ;;  %v992_v48 = vld [vmem:[%s1269_s1 + $0x168] sm:$0xff]   ;;  %v996_v52 = vld [vmem:[%s1269_s1 + $0x160] sm:$0xff]  }
  0x10   :  { %871 = vmatpush3.bf16.msra.mxu0 %v966_v14  ;;  %v991_v47 = vld [vmem:[%s1269_s1 + $0x1b0] sm:$0xff]   ;;  %v993_v49 = vld [vmem:[%s1269_s1 + $0x1e8] sm:$0xff]   ;;  %v997_v53 = vld [vmem:[%s1269_s1 + $0x1e0] sm:$0xff]  }
  0x11   :  { %893 = vmatpush3.bf16.msra.mxu1 %v967_v15  ;;  %872 = vmatprep.subr.bf16.mxu0 %v968_v16  ;;  %v994_v50 = vld [vmem:[%s1269_s1 + $0x128] sm:$0xff]   ;;  %v998_v54 = vld [vmem:[%s1269_s1 + $0x120] sm:$0xff]   ;;  %v1000_v56 = vld [vmem:[%s1269_s1 + $0x158] sm:$0xff]  }
  0x12   :  { %894 = vmatprep.subr.bf16.mxu1 %v969_v17  ;;  %615 = vmatprep.mubr.bf16.mxu0 %v792_v36  ;;  %v995_v51 = vld [vmem:[%s1269_s1 + $0x1a8] sm:$0xff]   ;;  %v999_v55 = vld [vmem:[%s1269_s1 + $0x1a0] sm:$0xff]   ;;  %v1001_v57 = vld [vmem:[%s1269_s1 + $0x1d8] sm:$0xff]  }
  0x13   :  { %656 = vmatprep.mubr.bf16.mxu1 %v794_v39  ;;  %v1002_v58 = vld [vmem:[%s1269_s1 + $0x118] sm:$0xff]   ;;  %v1004_v60 = vld [vmem:[%s1269_s1 + $0x150] sm:$0xff]   ;;  %v1008_v0 = vld [vmem:[%s1269_s1 + $0x148] sm:$0xff]  }
  0x14   :  { %873 = vmatpush3.bf16.msra.mxu0 %v970_v18  ;;  %v1003_v59 = vld [vmem:[%s1269_s1 + $0x198] sm:$0xff]   ;;  %v1005_v61 = vld [vmem:[%s1269_s1 + $0x1d0] sm:$0xff]   ;;  %v1009_v1 = vld [vmem:[%s1269_s1 + $0x1c8] sm:$0xff]  }
  0x15   :  { %895 = vmatpush3.bf16.msra.mxu1 %v971_v19  ;;  %874 = vmatprep.subr.bf16.mxu0 %v972_v20  ;;  %v1006_v62 = vld [vmem:[%s1269_s1 + $0x110] sm:$0xff]   ;;  %v1010_v2 = vld [vmem:[%s1269_s1 + $0x108] sm:$0xff]   ;;  %v1012_v4 = vld [vmem:[%s1269_s1 + $0x140] sm:$0xff]  }
  0x16   :  { %896 = vmatprep.subr.bf16.mxu1 %v973_v21  ;;  %v1007_v63 = vld [vmem:[%s1269_s1 + $0x190] sm:$0xff]   ;;  %v1011_v3 = vld [vmem:[%s1269_s1 + $0x188] sm:$0xff]   ;;  %v1013_v5 = vld [vmem:[%s1269_s1 + $0x1c0] sm:$0xff]  }
  0x17   :  { %v1014_v6 = vld [vmem:[%s1269_s1 + $0x100] sm:$0xff]   ;;  %v25_v8 = vld [vmem:[%s1270_s0 + $0x10] sm:$0xff]  ;;  %v26_v12 = vld [vmem:[%s1270_s0 + $0x18] sm:$0xff] }
  0x18   :  { %875 = vmatpush3.bf16.msra.mxu0 %v974_v22  ;;  %v1015_v7 = vld [vmem:[%s1269_s1 + $0x180] sm:$0xff]   ;;  %v29_v9 = vld [vmem:[%s1270_s0 + $0x30] sm:$0xff]  ;;  %v30_v13 = vld [vmem:[%s1270_s0 + $0x38] sm:$0xff] }
  0x19   :  { %897 = vmatpush3.bf16.msra.mxu1 %v975_v23  ;;  %876 = vmatprep.subr.bf16.mxu0 %v976_v24  ;;  %v795_v10 = vcombine.low %v25_v8, %v29_v9  ;;  %v796_v11 = vcombine.high %v25_v8, %v29_v9  ;;  %v797_v14 = vcombine.low %v26_v12, %v30_v13 }
  0x1a   :  { %898 = vmatprep.subr.bf16.mxu1 %v977_v25  ;;  %v798_v15 = vcombine.high %v26_v12, %v30_v13 }
  0x1c   :  { %877 = vmatpush3.bf16.msra.mxu0 %v978_v26 }
  0x1d   :  { %899 = vmatpush3.bf16.msra.mxu1 %v979_v27  ;;  %878 = vmatprep.subr.bf16.mxu0 %v980_v28 }
  0x1e   :  { %900 = vmatprep.subr.bf16.mxu1 %v981_v29 }
  0x20   :  { %879 = vmatpush3.bf16.msra.mxu0 %v982_v30 }
  0x21   :  { %901 = vmatpush3.bf16.msra.mxu1 %v983_v31  ;;  %908 = vmatprep.subr.bf16.mxu0 %v984_v40 }
  0x22   :  { %930 = vmatprep.subr.bf16.mxu1 %v985_v41 }
  0x23   :  { %616 = vmatmul.mubr.bf16.vlgmr.msra.gmra.mxu0 %v791_v35 }
  0x24   :  { %657 = vmatmul.mubr.bf16.vlgmr.msra.gmra.mxu1 %v793_v38  ;;  %909 = vmatpush3.bf16.msra.mxu0 %v986_v42  ;;  %v863_v38 = vld [vmem:[%s1271_s2] ss:$0 sm:$0xff] }
  0x25   :  { %931 = vmatpush3.bf16.msra.mxu1 %v987_v43  ;;  %910 = vmatprep.subr.bf16.mxu0 %v988_v44 }
  0x26   :  { %932 = vmatprep.subr.bf16.mxu1 %v989_v45  ;;  %697 = vmatprep.mubr.bf16.mxu0 %v796_v11 }
  0x27   :  { %738 = vmatprep.mubr.bf16.mxu1 %v798_v15 }
  0x28   :  { %911 = vmatpush3.bf16.msra.mxu0 %v990_v46 }
  0x29   :  { %933 = vmatpush3.bf16.msra.mxu1 %v991_v47  ;;  %912 = vmatprep.subr.bf16.mxu0 %v992_v48 }
  0x2a   :  { %934 = vmatprep.subr.bf16.mxu1 %v993_v49 }
  0x2c   :  { %913 = vmatpush3.bf16.msra.mxu0 %v994_v50 }
  0x2d   :  { %935 = vmatpush3.bf16.msra.mxu1 %v995_v51  ;;  %914 = vmatprep.subr.bf16.mxu0 %v996_v52 }
  0x2e   :  { %936 = vmatprep.subr.bf16.mxu1 %v997_v53 }
  0x30   :  { %915 = vmatpush3.bf16.msra.mxu0 %v998_v54 }
  0x31   :  { %937 = vmatpush3.bf16.msra.mxu1 %v999_v55  ;;  %916 = vmatprep.subr.bf16.mxu0 %v1000_v56 }
  0x32   :  { %938 = vmatprep.subr.bf16.mxu1 %v1001_v57 }
  0x34   :  { %917 = vmatpush3.bf16.msra.mxu0 %v1002_v58 }
  0x35   :  { %939 = vmatpush3.bf16.msra.mxu1 %v1003_v59  ;;  %918 = vmatprep.subr.bf16.mxu0 %v1004_v60 }
  0x36   :  { %940 = vmatprep.subr.bf16.mxu1 %v1005_v61 }
  0x38   :  { %919 = vmatpush3.bf16.msra.mxu0 %v1006_v62 }
  0x39   :  { %941 = vmatpush3.bf16.msra.mxu1 %v1007_v63  ;;  %920 = vmatprep.subr.bf16.mxu0 %v1008_v0 }
  0x3a   :  { %942 = vmatprep.subr.bf16.mxu1 %v1009_v1 }
  0x3c   :  { %921 = vmatpush3.bf16.msra.mxu0 %v1010_v2 }
  0x3d   :  { %943 = vmatpush3.bf16.msra.mxu1 %v1011_v3  ;;  %922 = vmatprep.subr.bf16.mxu0 %v1012_v4 }
  0x3e   :  { %944 = vmatprep.subr.bf16.mxu1 %v1013_v5 }
  0x40   :  { %923 = vmatpush3.bf16.msra.mxu0 %v1014_v6 }
  0x41   :  { %945 = vmatpush3.bf16.msra.mxu1 %v1015_v7 }
  0x43   :  { %698 = vmatmul.mubr.bf16.vlgmr.msra.gmra.mxu0 %v795_v10 }
  0x44   :  { %739 = vmatmul.mubr.bf16.vlgmr.msra.gmra.mxu1 %v797_v14 }
  0xe3   :  { %v880_v16 = vpop.f32.mrf.mxu0 }
  0xe4   :  { %v902_v17 = vpop.f32.mrf.mxu1 }
  0xe5   :  { %v881_v18 = vpop.f32.mrf.mxu0 }
  0xe6   :  { %v903_v19 = vpop.f32.mrf.mxu1  ;;  %v882_v23 = vadd.f32 %v881_v18, %v880_v16 }
  0xe7   :  { %v883_v20 = vpop.f32.mrf.mxu0  ;;  %v904_v24 = vadd.f32 %v903_v19, %v902_v17 }
  0xe8   :  { %v905_v21 = vpop.f32.mrf.mxu1 }
  0xe9   :  { %v884_v22 = vpop.f32.mrf.mxu0  ;;  %v659_v29 = vadd.f32 %v904_v24, %v882_v23 }
  0xea   :  { %v906_v25 = vpop.f32.mrf.mxu1  ;;  %v885_v30 = vadd.f32 %v884_v22, %v883_v20 }
  0xeb   :  { %v907_v31 = vadd.f32 %v906_v25, %v905_v21 }
  0xed   :  { %v662_v40 = vadd.f32 %v907_v31, %v885_v30 }
 0x103   :  { %v924_v26 = vpop.f32.mrf.mxu0 }
 0x104   :  { %v946_v27 = vpop.f32.mrf.mxu1 }
 0x105   :  { %v925_v28 = vpop.f32.mrf.mxu0 }
 0x106   :  { %v926_v32 = vadd.f32 %v925_v28, %v924_v26  ;;  %v947_v33 = vpop.f32.mrf.mxu1 }
 0x107   :  { %v927_v34 = vpop.f32.mrf.mxu0  ;;  %v948_v36 = vadd.f32 %v947_v33, %v946_v27 }
 0x108   :  { %v700_v35 = vadd.f32 %v926_v32, %v659_v29  ;;  %v949_v37 = vpop.f32.mrf.mxu1 }
 0x109   :  { %v928_v39 = vpop.f32.mrf.mxu0 }
 0x10a   :  { %v741_v41 = vadd.f32 %v948_v36, %v700_v35  ;;  %v929_v42 = vadd.f32 %v928_v39, %v927_v34  ;;  %v950_v43 = vpop.f32.mrf.mxu1 }
 0x10b   :  { %v951_v46 = vadd.f32 %v950_v43, %v949_v37 }
 0x10c   :  { %v763_v44 = vadd.f32 %v863_v38, %v741_v41  ;;  %v703_v45 = vadd.f32 %v929_v42, %v662_v40 }
 0x10e   :  { %v765_v47 = vand.u32 2147483647, %v763_v44  ;;  %v744_v48 = vadd.f32 %v951_v46, %v703_v45  ;;  %vm779_vm0 = vcmp.ge.f32.partialorder %v763_v44, 0.0 }
 0x110   :  { %v767_v49 = vsub.f32 0.0, %v765_v47  ;;  %v764_v50 = vadd.f32 %v863_v38, %v744_v48 }
 0x112   :  { %v769_v51 = vmul.f32 1.442695, %v767_v49  ;;  %v766_v52 = vand.u32 2147483647, %v764_v50  ;;  %vm780_vm1 = vcmp.ge.f32.partialorder %v764_v50, 0.0 }
 0x114   :  { %1016 = vpow2.f32 %v769_v51  ;;  %v768_v53 = vsub.f32 0.0, %v766_v52 }
 0x116   :  { %v771_v54 = vmul.f32 1.442695, %v768_v53 }
 0x118   :  { %1018 = vpow2.f32 %v771_v54 }
 0x121   :  { %v1017_v55 = vpop.eup %1016 }
 0x122   :  { %v773_v56 = vadd.f32 1.0, %v1017_v55 }
 0x124   :  { %1020 = vrcp.f32 %v773_v56 }
 0x125   :  { %v1019_v57 = vpop.eup %1018 }
 0x126   :  { %v774_v58 = vadd.f32 1.0, %v1019_v57 }
 0x128   :  { %1022 = vrcp.f32 %v774_v58 }
 0x131   :  { %v1021_v59 = vpop.eup %1020 }
 0x132   :  { %v781_v60 = vmul.f32 %v1021_v59, %v1017_v55 }
 0x134   :  { %v783_v61 = vsel %vm779_vm0, %v1021_v59, %v781_v60 }
 0x135   :  { %v1023_v62 = vpop.eup %1022  ;;  %785 = vst [vmem:[%s1272_s3] sm:$0xff] %v783_v61 }
 0x136   :  { %v782_v63 = vmul.f32 %v1023_v62, %v1019_v57 }
 0x138   :  { %v784_v0 = vsel %vm780_vm1, %v1023_v62, %v782_v63 }
 0x139   :  { %786 = vst [vmem:[%s1272_s3 + $0x8] sm:$0xff] %v784_v0 }

</bundles_post_ra>
